<compile_context>
chip_gen: v7x
topology: tpu7x:2x2x1
jax: 0.10.0
libtpu: 0.0.40
codegen_flags: <defaults>
</compile_context>

<pallas_src>
import numpy as np
import jax
import jax.numpy as jnp
from jax.experimental import pallas as pl
from jax.experimental.pallas import tpu as pltpu


def _build_tap_pool_operators(H, W, pool=2, ksize=3):
    """M[tap, si, so] = contribution of input pixel si to pooled output so via
    conv tap (ky, kx) of a ksize x ksize, stride-1, pad-(ksize//2) conv followed
    by a pool x pool average pool (built once at setup time, tiny)."""
    pad = ksize // 2
    OH, OW = H // pool, W // pool
    mats = np.zeros((ksize * ksize, H * W, OH * OW), np.float32)
    inv = 1.0 / (pool * pool)
    for ky in range(ksize):
        for kx in range(ksize):
            tap = ky * ksize + kx
            for yi in range(H):
                yo = yi - ky + pad          # conv-output row fed by this tap
                if not (0 <= yo < H):
                    continue
                po = yo // pool
                for xi in range(W):
                    xo = xi - kx + pad
                    if not (0 <= xo < W):
                        continue
                    qo = xo // pool
                    mats[tap, yi * W + xi, po * OW + qo] = inv
    return jnp.asarray(mats)


def _trans_branch_kernel(x_ref, scale_ref, bias_ref, w_ref, m_ref, o_ref):
    # x_ref:      (1, Cin, H*W)     activation for one batch element (lane-dense)
    # scale/bias: (Cin, 1)          folded BatchNorm affine (inference form)
    # w_ref:      (9, Cout, Cin)    conv weight per 3x3 tap
    # m_ref:      (9, H*W, OH*OW)   shift + 2x2 avg-pool operator per tap
    # o_ref:      (1, Cout, OH*OW)
    x = x_ref[0].astype(jnp.float32)                       # (Cin, HW)
    scale = scale_ref[...].astype(jnp.float32)             # (Cin, 1)
    bias = bias_ref[...].astype(jnp.float32)               # (Cin, 1)
    xa = jnp.maximum(x * scale + bias, 0.0)                # BN + ReLU

    cout = w_ref.shape[1]
    ohw = m_ref.shape[2]
    acc = jnp.zeros((cout, ohw), jnp.float32)
    for tap in range(w_ref.shape[0]):                      # 9 taps, unrolled
        shifted = jnp.dot(xa, m_ref[tap].astype(jnp.float32),
                          preferred_element_type=jnp.float32)       # (Cin, OHW)
        acc = acc + jnp.dot(w_ref[tap].astype(jnp.float32), shifted,
                            preferred_element_type=jnp.float32)     # (Cout, OHW)
    o_ref[0] = acc.astype(o_ref.dtype)


def _fold_bn(gamma, beta, mean, var, eps=1e-5):
    scale = gamma / jnp.sqrt(var + eps)
    bias = beta - mean * scale
    return scale.reshape(-1, 1), bias.reshape(-1, 1)


def trans_branch(x, bn_scale, bn_bias, conv_w, pool=2):
    """One TransBlock branch: avg_pool2d(conv3x3(relu(bn(x))), pool).
    x: (N, Cin, H, W) NCHW; conv_w: (Cout, Cin, 3, 3); bn_scale/bias: (Cin, 1)."""
    N, Cin, H, W = x.shape
    Cout = conv_w.shape[0]
    assert H % pool == 0 and W % pool == 0, "spatial dims must be divisible by pool"
    OH, OW = H // pool, W // pool
    HW, OHW = H * W, OH * OW

    x_flat = x.reshape(N, Cin, HW)                         # merge minor dims (free)
    w_taps = jnp.transpose(conv_w, (2, 3, 0, 1)).reshape(9, Cout, Cin)  # tiny
    m_taps = _build_tap_pool_operators(H, W, pool=pool)

    out = pl.pallas_call(
        _trans_branch_kernel,
        out_shape=jax.ShapeDtypeStruct((N, Cout, OHW), x.dtype),
        grid=(N,),
        in_specs=[
            pl.BlockSpec((1, Cin, HW), lambda n: (n, 0, 0)),
            pl.BlockSpec((Cin, 1), lambda n: (0, 0)),
            pl.BlockSpec((Cin, 1), lambda n: (0, 0)),
            pl.BlockSpec((9, Cout, Cin), lambda n: (0, 0, 0)),
            pl.BlockSpec((9, HW, OHW), lambda n: (0, 0, 0)),
        ],
        out_specs=pl.BlockSpec((1, Cout, OHW), lambda n: (n, 0, 0)),
        compiler_params=pltpu.CompilerParams(
            dimension_semantics=("parallel",)),
    )(x_flat, bn_scale, bn_bias, w_taps, m_taps)
    return out.reshape(N, Cout, OH, OW)


def trans_block(x1, x2, params1, params2):
    """Pallas equivalent of TransBlock.forward for input (x1, x2, pred) -> (y1, y2).
    params_i = (gamma, beta, running_mean, running_var, conv_weight)."""
    # TODO(synk): training-mode BatchNorm (batch statistics + running-stat update)
    # is not implemented; BN is applied in inference form with the given stats.
    g1, b1, m1, v1, w1 = params1
    g2, b2, m2, v2, w2 = params2
    s1, o1 = _fold_bn(g1, b1, m1, v1)
    s2, o2 = _fold_bn(g2, b2, m2, v2)
    y1 = trans_branch(x1, s1, o1, w1)
    y2 = trans_branch(x2, s2, o2, w2)
    return y1, y2


def _ref_branch(x, gamma, beta, mean, var, w, eps=1e-5):
    """Pure-JAX reference for one branch (same inference-form BN)."""
    scale = gamma / jnp.sqrt(var + eps)
    bias = beta - mean * scale
    xa = jnp.maximum(x * scale[None, :, None, None] + bias[None, :, None, None], 0.0)
    y = jax.lax.conv_general_dilated(
        xa, w, window_strides=(1, 1), padding=((1, 1), (1, 1)),
        dimension_numbers=("NCHW", "OIHW", "NCHW"),
        precision=jax.lax.Precision.HIGHEST)
    N, C, H, W = y.shape
    return y.reshape(N, C, H // 2, 2, W // 2, 2).mean(axis=(3, 5))


if __name__ == "__main__":
    key = jax.random.PRNGKey(0)
    ks = jax.random.split(key, 6)
    N, Cin, Cout, H, W = 2, 4, 8, 16, 16

    x1 = jax.random.normal(ks[0], (N, Cin, H, W), jnp.float32)
    x2 = jax.random.normal(ks[1], (N, Cin, H, W), jnp.float32)

    def bn_params(k):
        kg, kb, km, kv = jax.random.split(k, 4)
        gamma = jax.random.uniform(kg, (Cin,), jnp.float32, 0.5, 1.5)
        beta = jax.random.normal(kb, (Cin,), jnp.float32) * 0.1
        mean = jax.random.normal(km, (Cin,), jnp.float32) * 0.1
        var = jax.random.uniform(kv, (Cin,), jnp.float32, 0.5, 1.5)
        return gamma, beta, mean, var

    g1, b1, m1, v1 = bn_params(ks[2])
    g2, b2, m2, v2 = bn_params(ks[3])
    w1 = jax.random.normal(ks[4], (Cout, Cin, 3, 3), jnp.float32) * 0.1
    w2 = jax.random.normal(ks[5], (Cout, Cin, 3, 3), jnp.float32) * 0.1

    y1, y2 = trans_block(x1, x2, (g1, b1, m1, v1, w1), (g2, b2, m2, v2, w2))
    y1 = jax.block_until_ready(y1)
    y2 = jax.block_until_ready(y2)

    assert y1.shape == (N, Cout, H // 2, W // 2)
    assert y2.shape == (N, Cout, H // 2, W // 2)

    r1 = _ref_branch(x1, g1, b1, m1, v1, w1)
    r2 = _ref_branch(x2, g2, b2, m2, v2, w2)
    assert jnp.allclose(y1, r1, atol=2e-3, rtol=2e-3), float(jnp.max(jnp.abs(y1 - r1)))
    assert jnp.allclose(y2, r2, atol=2e-3, rtol=2e-3), float(jnp.max(jnp.abs(y2 - r2)))

    print("KERNEL_OK")
</pallas_src>

<mosaic_0001>
module attributes {stable_mosaic.version = 11 : i64} {
  func.func @_trans_branch_kernel(%arg0: i32, %arg1: memref<1x4x256xf32, #tpu.memory_space<vmem>>, %arg2: memref<4x1xf32, #tpu.memory_space<vmem>>, %arg3: memref<4x1xf32, #tpu.memory_space<vmem>>, %arg4: memref<9x8x4xf32, #tpu.memory_space<vmem>>, %arg5: memref<9x256x64xf32, #tpu.memory_space<vmem>>, %arg6: memref<1x8x64xf32, #tpu.memory_space<vmem>>) attributes {dimension_semantics = [#tpu.dimension_semantics<parallel>], iteration_bounds = array<i64: 2>, scalar_prefetch = 0 : i64, scratch_operands = 0 : i64, tpu.core_type = #tpu.core_type<tc>, window_params = [{transform_indices = @transform_0, window_bounds = array<i64: 1, 4, 256>}, {pipeline_mode = #tpu.pipeline_mode<synchronous>, transform_indices = @transform_1, window_bounds = array<i64: 4, 1>}, {pipeline_mode = #tpu.pipeline_mode<synchronous>, transform_indices = @transform_2, window_bounds = array<i64: 4, 1>}, {pipeline_mode = #tpu.pipeline_mode<synchronous>, transform_indices = @transform_3, window_bounds = array<i64: 9, 8, 4>}, {pipeline_mode = #tpu.pipeline_mode<synchronous>, transform_indices = @transform_4, window_bounds = array<i64: 9, 256, 64>}, {transform_indices = @transform_5, window_bounds = array<i64: 1, 8, 64>}]} {
    %c0 = arith.constant 0 : index
    %c0_0 = arith.constant 0 : index
    %c0_1 = arith.constant 0 : index
    %0 = vector.load %arg1[%c0, %c0_0, %c0_1] : memref<1x4x256xf32, #tpu.memory_space<vmem>>, vector<1x4x256xf32>
    %1 = vector.shape_cast %0 : vector<1x4x256xf32> to vector<4x256xf32>
    %c0_2 = arith.constant 0 : index
    %c0_3 = arith.constant 0 : index
    %2 = vector.load %arg2[%c0_2, %c0_3] : memref<4x1xf32, #tpu.memory_space<vmem>>, vector<4x1xf32>
    %c0_4 = arith.constant 0 : index
    %c0_5 = arith.constant 0 : index
    %3 = vector.load %arg3[%c0_4, %c0_5] : memref<4x1xf32, #tpu.memory_space<vmem>>, vector<4x1xf32>
    %4 = vector.broadcast %2 : vector<4x1xf32> to vector<4x256xf32>
    %5 = arith.mulf %1, %4 : vector<4x256xf32>
    %6 = vector.broadcast %3 : vector<4x1xf32> to vector<4x256xf32>
    %7 = arith.addf %5, %6 : vector<4x256xf32>
    %cst = arith.constant 0.000000e+00 : f32
    %8 = vector.broadcast %cst : f32 to vector<4x256xf32>
    %9 = arith.maximumf %7, %8 : vector<4x256xf32>
    %cst_6 = arith.constant 0.000000e+00 : f32
    %10 = vector.broadcast %cst_6 : f32 to vector<8x64xf32>
    %c0_7 = arith.constant 0 : index
    %c0_8 = arith.constant 0 : index
    %c0_9 = arith.constant 0 : index
    %11 = vector.load %arg5[%c0_7, %c0_8, %c0_9] : memref<9x256x64xf32, #tpu.memory_space<vmem>>, vector<1x256x64xf32>
    %12 = vector.shape_cast %11 : vector<1x256x64xf32> to vector<256x64xf32>
    %cst_10 = arith.constant dense<0.000000e+00> : vector<4x64xf32>
    %13 = tpu.matmul %9, %12, %cst_10 {dimension_numbers = #tpu.dot_dimension_numbers<[1], [0], [0], [1], [0, 0, 1, 1], [], []>} : vector<4x256xf32>, vector<256x64xf32>, vector<4x64xf32> -> vector<4x64xf32>
    %c0_11 = arith.constant 0 : index
    %c0_12 = arith.constant 0 : index
    %c0_13 = arith.constant 0 : index
    %14 = vector.load %arg4[%c0_11, %c0_12, %c0_13] : memref<9x8x4xf32, #tpu.memory_space<vmem>>, vector<1x8x4xf32>
    %15 = vector.shape_cast %14 : vector<1x8x4xf32> to vector<8x4xf32>
    %cst_14 = arith.constant dense<0.000000e+00> : vector<8x64xf32>
    %16 = tpu.matmul %15, %13, %cst_14 {dimension_numbers = #tpu.dot_dimension_numbers<[1], [0], [0], [1], [0, 0, 1, 1], [], []>} : vector<8x4xf32>, vector<4x64xf32>, vector<8x64xf32> -> vector<8x64xf32>
    %17 = arith.addf %10, %16 : vector<8x64xf32>
    %c1 = arith.constant 1 : index
    %c0_15 = arith.constant 0 : index
    %c0_16 = arith.constant 0 : index
    %18 = vector.load %arg5[%c1, %c0_15, %c0_16] : memref<9x256x64xf32, #tpu.memory_space<vmem>>, vector<1x256x64xf32>
    %19 = vector.shape_cast %18 : vector<1x256x64xf32> to vector<256x64xf32>
    %cst_17 = arith.constant dense<0.000000e+00> : vector<4x64xf32>
    %20 = tpu.matmul %9, %19, %cst_17 {dimension_numbers = #tpu.dot_dimension_numbers<[1], [0], [0], [1], [0, 0, 1, 1], [], []>} : vector<4x256xf32>, vector<256x64xf32>, vector<4x64xf32> -> vector<4x64xf32>
    %c1_18 = arith.constant 1 : index
    %c0_19 = arith.constant 0 : index
    %c0_20 = arith.constant 0 : index
    %21 = vector.load %arg4[%c1_18, %c0_19, %c0_20] : memref<9x8x4xf32, #tpu.memory_space<vmem>>, vector<1x8x4xf32>
    %22 = vector.shape_cast %21 : vector<1x8x4xf32> to vector<8x4xf32>
    %cst_21 = arith.constant dense<0.000000e+00> : vector<8x64xf32>
    %23 = tpu.matmul %22, %20, %cst_21 {dimension_numbers = #tpu.dot_dimension_numbers<[1], [0], [0], [1], [0, 0, 1, 1], [], []>} : vector<8x4xf32>, vector<4x64xf32>, vector<8x64xf32> -> vector<8x64xf32>
    %24 = arith.addf %17, %23 : vector<8x64xf32>
    %c2 = arith.constant 2 : index
    %c0_22 = arith.constant 0 : index
    %c0_23 = arith.constant 0 : index
    %25 = vector.load %arg5[%c2, %c0_22, %c0_23] : memref<9x256x64xf32, #tpu.memory_space<vmem>>, vector<1x256x64xf32>
    %26 = vector.shape_cast %25 : vector<1x256x64xf32> to vector<256x64xf32>
    %cst_24 = arith.constant dense<0.000000e+00> : vector<4x64xf32>
    %27 = tpu.matmul %9, %26, %cst_24 {dimension_numbers = #tpu.dot_dimension_numbers<[1], [0], [0], [1], [0, 0, 1, 1], [], []>} : vector<4x256xf32>, vector<256x64xf32>, vector<4x64xf32> -> vector<4x64xf32>
    %c2_25 = arith.constant 2 : index
    %c0_26 = arith.constant 0 : index
    %c0_27 = arith.constant 0 : index
    %28 = vector.load %arg4[%c2_25, %c0_26, %c0_27] : memref<9x8x4xf32, #tpu.memory_space<vmem>>, vector<1x8x4xf32>
    %29 = vector.shape_cast %28 : vector<1x8x4xf32> to vector<8x4xf32>
    %cst_28 = arith.constant dense<0.000000e+00> : vector<8x64xf32>
    %30 = tpu.matmul %29, %27, %cst_28 {dimension_numbers = #tpu.dot_dimension_numbers<[1], [0], [0], [1], [0, 0, 1, 1], [], []>} : vector<8x4xf32>, vector<4x64xf32>, vector<8x64xf32> -> vector<8x64xf32>
    %31 = arith.addf %24, %30 : vector<8x64xf32>
    %c3 = arith.constant 3 : index
    %c0_29 = arith.constant 0 : index
    %c0_30 = arith.constant 0 : index
    %32 = vector.load %arg5[%c3, %c0_29, %c0_30] : memref<9x256x64xf32, #tpu.memory_space<vmem>>, vector<1x256x64xf32>
    %33 = vector.shape_cast %32 : vector<1x256x64xf32> to vector<256x64xf32>
    %cst_31 = arith.constant dense<0.000000e+00> : vector<4x64xf32>
    %34 = tpu.matmul %9, %33, %cst_31 {dimension_numbers = #tpu.dot_dimension_numbers<[1], [0], [0], [1], [0, 0, 1, 1], [], []>} : vector<4x256xf32>, vector<256x64xf32>, vector<4x64xf32> -> vector<4x64xf32>
    %c3_32 = arith.constant 3 : index
    %c0_33 = arith.constant 0 : index
    %c0_34 = arith.constant 0 : index
    %35 = vector.load %arg4[%c3_32, %c0_33, %c0_34] : memref<9x8x4xf32, #tpu.memory_space<vmem>>, vector<1x8x4xf32>
    %36 = vector.shape_cast %35 : vector<1x8x4xf32> to vector<8x4xf32>
    %cst_35 = arith.constant dense<0.000000e+00> : vector<8x64xf32>
    %37 = tpu.matmul %36, %34, %cst_35 {dimension_numbers = #tpu.dot_dimension_numbers<[1], [0], [0], [1], [0, 0, 1, 1], [], []>} : vector<8x4xf32>, vector<4x64xf32>, vector<8x64xf32> -> vector<8x64xf32>
    %38 = arith.addf %31, %37 : vector<8x64xf32>
    %c4 = arith.constant 4 : index
    %c0_36 = arith.constant 0 : index
    %c0_37 = arith.constant 0 : index
    %39 = vector.load %arg5[%c4, %c0_36, %c0_37] : memref<9x256x64xf32, #tpu.memory_space<vmem>>, vector<1x256x64xf32>
    %40 = vector.shape_cast %39 : vector<1x256x64xf32> to vector<256x64xf32>
    %cst_38 = arith.constant dense<0.000000e+00> : vector<4x64xf32>
    %41 = tpu.matmul %9, %40, %cst_38 {dimension_numbers = #tpu.dot_dimension_numbers<[1], [0], [0], [1], [0, 0, 1, 1], [], []>} : vector<4x256xf32>, vector<256x64xf32>, vector<4x64xf32> -> vector<4x64xf32>
    %c4_39 = arith.constant 4 : index
    %c0_40 = arith.constant 0 : index
    %c0_41 = arith.constant 0 : index
    %42 = vector.load %arg4[%c4_39, %c0_40, %c0_41] : memref<9x8x4xf32, #tpu.memory_space<vmem>>, vector<1x8x4xf32>
    %43 = vector.shape_cast %42 : vector<1x8x4xf32> to vector<8x4xf32>
    %cst_42 = arith.constant dense<0.000000e+00> : vector<8x64xf32>
    %44 = tpu.matmul %43, %41, %cst_42 {dimension_numbers = #tpu.dot_dimension_numbers<[1], [0], [0], [1], [0, 0, 1, 1], [], []>} : vector<8x4xf32>, vector<4x64xf32>, vector<8x64xf32> -> vector<8x64xf32>
    %45 = arith.addf %38, %44 : vector<8x64xf32>
    %c5 = arith.constant 5 : index
    %c0_43 = arith.constant 0 : index
    %c0_44 = arith.constant 0 : index
    %46 = vector.load %arg5[%c5, %c0_43, %c0_44] : memref<9x256x64xf32, #tpu.memory_space<vmem>>, vector<1x256x64xf32>
    %47 = vector.shape_cast %46 : vector<1x256x64xf32> to vector<256x64xf32>
    %cst_45 = arith.constant dense<0.000000e+00> : vector<4x64xf32>
    %48 = tpu.matmul %9, %47, %cst_45 {dimension_numbers = #tpu.dot_dimension_numbers<[1], [0], [0], [1], [0, 0, 1, 1], [], []>} : vector<4x256xf32>, vector<256x64xf32>, vector<4x64xf32> -> vector<4x64xf32>
    %c5_46 = arith.constant 5 : index
    %c0_47 = arith.constant 0 : index
    %c0_48 = arith.constant 0 : index
    %49 = vector.load %arg4[%c5_46, %c0_47, %c0_48] : memref<9x8x4xf32, #tpu.memory_space<vmem>>, vector<1x8x4xf32>
    %50 = vector.shape_cast %49 : vector<1x8x4xf32> to vector<8x4xf32>
    %cst_49 = arith.constant dense<0.000000e+00> : vector<8x64xf32>
    %51 = tpu.matmul %50, %48, %cst_49 {dimension_numbers = #tpu.dot_dimension_numbers<[1], [0], [0], [1], [0, 0, 1, 1], [], []>} : vector<8x4xf32>, vector<4x64xf32>, vector<8x64xf32> -> vector<8x64xf32>
    %52 = arith.addf %45, %51 : vector<8x64xf32>
    %c6 = arith.constant 6 : index
    %c0_50 = arith.constant 0 : index
    %c0_51 = arith.constant 0 : index
    %53 = vector.load %arg5[%c6, %c0_50, %c0_51] : memref<9x256x64xf32, #tpu.memory_space<vmem>>, vector<1x256x64xf32>
    %54 = vector.shape_cast %53 : vector<1x256x64xf32> to vector<256x64xf32>
    %cst_52 = arith.constant dense<0.000000e+00> : vector<4x64xf32>
    %55 = tpu.matmul %9, %54, %cst_52 {dimension_numbers = #tpu.dot_dimension_numbers<[1], [0], [0], [1], [0, 0, 1, 1], [], []>} : vector<4x256xf32>, vector<256x64xf32>, vector<4x64xf32> -> vector<4x64xf32>
    %c6_53 = arith.constant 6 : index
    %c0_54 = arith.constant 0 : index
    %c0_55 = arith.constant 0 : index
    %56 = vector.load %arg4[%c6_53, %c0_54, %c0_55] : memref<9x8x4xf32, #tpu.memory_space<vmem>>, vector<1x8x4xf32>
    %57 = vector.shape_cast %56 : vector<1x8x4xf32> to vector<8x4xf32>
    %cst_56 = arith.constant dense<0.000000e+00> : vector<8x64xf32>
    %58 = tpu.matmul %57, %55, %cst_56 {dimension_numbers = #tpu.dot_dimension_numbers<[1], [0], [0], [1], [0, 0, 1, 1], [], []>} : vector<8x4xf32>, vector<4x64xf32>, vector<8x64xf32> -> vector<8x64xf32>
    %59 = arith.addf %52, %58 : vector<8x64xf32>
    %c7 = arith.constant 7 : index
    %c0_57 = arith.constant 0 : index
    %c0_58 = arith.constant 0 : index
    %60 = vector.load %arg5[%c7, %c0_57, %c0_58] : memref<9x256x64xf32, #tpu.memory_space<vmem>>, vector<1x256x64xf32>
    %61 = vector.shape_cast %60 : vector<1x256x64xf32> to vector<256x64xf32>
    %cst_59 = arith.constant dense<0.000000e+00> : vector<4x64xf32>
    %62 = tpu.matmul %9, %61, %cst_59 {dimension_numbers = #tpu.dot_dimension_numbers<[1], [0], [0], [1], [0, 0, 1, 1], [], []>} : vector<4x256xf32>, vector<256x64xf32>, vector<4x64xf32> -> vector<4x64xf32>
    %c7_60 = arith.constant 7 : index
    %c0_61 = arith.constant 0 : index
    %c0_62 = arith.constant 0 : index
    %63 = vector.load %arg4[%c7_60, %c0_61, %c0_62] : memref<9x8x4xf32, #tpu.memory_space<vmem>>, vector<1x8x4xf32>
    %64 = vector.shape_cast %63 : vector<1x8x4xf32> to vector<8x4xf32>
    %cst_63 = arith.constant dense<0.000000e+00> : vector<8x64xf32>
    %65 = tpu.matmul %64, %62, %cst_63 {dimension_numbers = #tpu.dot_dimension_numbers<[1], [0], [0], [1], [0, 0, 1, 1], [], []>} : vector<8x4xf32>, vector<4x64xf32>, vector<8x64xf32> -> vector<8x64xf32>
    %66 = arith.addf %59, %65 : vector<8x64xf32>
    %c8 = arith.constant 8 : index
    %c0_64 = arith.constant 0 : index
    %c0_65 = arith.constant 0 : index
    %67 = vector.load %arg5[%c8, %c0_64, %c0_65] : memref<9x256x64xf32, #tpu.memory_space<vmem>>, vector<1x256x64xf32>
    %68 = vector.shape_cast %67 : vector<1x256x64xf32> to vector<256x64xf32>
    %cst_66 = arith.constant dense<0.000000e+00> : vector<4x64xf32>
    %69 = tpu.matmul %9, %68, %cst_66 {dimension_numbers = #tpu.dot_dimension_numbers<[1], [0], [0], [1], [0, 0, 1, 1], [], []>} : vector<4x256xf32>, vector<256x64xf32>, vector<4x64xf32> -> vector<4x64xf32>
    %c8_67 = arith.constant 8 : index
    %c0_68 = arith.constant 0 : index
    %c0_69 = arith.constant 0 : index
    %70 = vector.load %arg4[%c8_67, %c0_68, %c0_69] : memref<9x8x4xf32, #tpu.memory_space<vmem>>, vector<1x8x4xf32>
    %71 = vector.shape_cast %70 : vector<1x8x4xf32> to vector<8x4xf32>
    %cst_70 = arith.constant dense<0.000000e+00> : vector<8x64xf32>
    %72 = tpu.matmul %71, %69, %cst_70 {dimension_numbers = #tpu.dot_dimension_numbers<[1], [0], [0], [1], [0, 0, 1, 1], [], []>} : vector<8x4xf32>, vector<4x64xf32>, vector<8x64xf32> -> vector<8x64xf32>
    %73 = arith.addf %66, %72 : vector<8x64xf32>
    %c0_71 = arith.constant 0 : index
    %c0_72 = arith.constant 0 : index
    %c0_73 = arith.constant 0 : index
    %74 = vector.load %arg6[%c0_71, %c0_72, %c0_73] : memref<1x8x64xf32, #tpu.memory_space<vmem>>, vector<1x8x64xf32>
    %75 = vector.shape_cast %74 : vector<1x8x64xf32> to vector<8x64xf32>
    %76 = vector.shape_cast %73 : vector<8x64xf32> to vector<1x8x64xf32>
    tpu.vector_store %arg6[%c0_71, %c0_72, %c0_73], %76 {strides = array<i32>} : memref<1x8x64xf32, #tpu.memory_space<vmem>>, vector<1x8x64xf32>,
    return
  }
  func.func @transform_0(%arg0: i32) -> (i32, i32, i32) {
    %c0_i32 = arith.constant 0 : i32
    %c0_i32_0 = arith.constant 0 : i32
    %c0_i32_1 = arith.constant 0 : i32
    return %arg0, %c0_i32, %c0_i32_0 : i32, i32, i32
  }
  func.func @transform_1(%arg0: i32) -> (i32, i32) {
    %c0_i32 = arith.constant 0 : i32
    %c0_i32_0 = arith.constant 0 : i32
    %c0_i32_1 = arith.constant 0 : i32
    return %c0_i32, %c0_i32_0 : i32, i32
  }
  func.func @transform_2(%arg0: i32) -> (i32, i32) {
    %c0_i32 = arith.constant 0 : i32
    %c0_i32_0 = arith.constant 0 : i32
    %c0_i32_1 = arith.constant 0 : i32
    return %c0_i32, %c0_i32_0 : i32, i32
  }
  func.func @transform_3(%arg0: i32) -> (i32, i32, i32) {
    %c0_i32 = arith.constant 0 : i32
    %c0_i32_0 = arith.constant 0 : i32
    %c0_i32_1 = arith.constant 0 : i32
    %c0_i32_2 = arith.constant 0 : i32
    return %c0_i32, %c0_i32_0, %c0_i32_1 : i32, i32, i32
  }
  func.func @transform_4(%arg0: i32) -> (i32, i32, i32) {
    %c0_i32 = arith.constant 0 : i32
    %c0_i32_0 = arith.constant 0 : i32
    %c0_i32_1 = arith.constant 0 : i32
    %c0_i32_2 = arith.constant 0 : i32
    return %c0_i32, %c0_i32_0, %c0_i32_1 : i32, i32, i32
  }
  func.func @transform_5(%arg0: i32) -> (i32, i32, i32) {
    %c0_i32 = arith.constant 0 : i32
    %c0_i32_0 = arith.constant 0 : i32
    %c0_i32_1 = arith.constant 0 : i32
    return %arg0, %c0_i32, %c0_i32_0 : i32, i32, i32
  }
}

</mosaic_0001>

<bundles_post_ra>
// kernel: tpu_custom_call.1
= control target key start
LH: loop header
LB: loop body
LE: loop exit
PB: predicated region body
PF: predicated region fallthrough
CT: control target
= control target key end

     0   :  { %10 = vsyncpa [#allocation3], 0  ;;  %s4158_s0 = inlined_call_operand.vmem [shape: f32[2,4,256], index: 0, kind: input, shape index: {}]   ;;  %s4159_s1 = inlined_call_operand.vmem [shape: f32[4,1], index: 1, kind: input, shape index: {}]   ;;  %s4160_s2 = inlined_call_operand.vmem [shape: f32[4,1], index: 2, kind: input, shape index: {}]   ;;  %s4161_s3 = inlined_call_operand.vmem [shape: f32[9,8,4], index: 3, kind: input, shape index: {}]   ;;  %s4162_s4 = inlined_call_operand.vmem [shape: f32[9,256,64], index: 4, kind: input, shape index: {}]   ;;  %s4163_s5 = inlined_call_operand.hbm [shape: f32[2,8,64], index: 5, kind: output, shape index: {}]  }
   0x1   :  { %12 = vsyncpa [#allocation3 + $0x1], 0  ;;  %s3086_s18 = smov 0   ;;  %s3088_s19 = smov 0  }
   0x2   :  { %s3090_s20 = smov 0   ;;  %s3092_s21 = smov 0  }
   0x3 LB: > { %s3107_s22 = sadd.s32 4294967295, %s3049_s21   ;;  %s1967_s23 = sadd.s32 4294967294, %s3049_s21   ;;  %s3049_s21 = sphi %s3092_s21, %s4169_s21   ;;  %s3045_s20 = sphi %s3090_s20, %s4168_s20   ;;  %s3041_s19 = sphi %s3088_s19, %s4167_s19   ;;  %s3037_s18 = sphi %s3086_s18, %s4166_s18  }
   0x4   : > { %s3111_s24 = sadd.s32 1, %s3049_s21   ;;  %s135_s25 = sadd.s32 1, %s3045_s20 }
   0x5   : > { %s132_s26 = ssub.s32 %s3049_s21, %s3111_s24  ;;  %p145_p0 = scmp.ne.s32.totalorder %s3045_s20, %s3041_s19 }
   0x6   : > { %p133_p1 = scmp.eq.s32.totalorder %s132_s26, 0  ;;  %p146_p2 = scmp.eq.s32.totalorder %s3107_s22, 1 }
   0x7   : > { %p151_p3 = scmp.ne.s32.totalorder %s3041_s19, %s3037_s18  ;;  %p152_p4 = scmp.eq.s32.totalorder %s1967_s23, 1 }
   0x8   : > { %s3122_s27 = scalar_select %p133_p1, %s3045_s20, %s135_s25  }
   0x9   : > { %p3124_p5 = por %p146_p2, %p145_p0  ;;  %p3128_p6 = por %p152_p4, %p151_p3 }
   0xa   : > { %p1970_p7 = scmp.ge.s32.totalorder %s3049_s21, 1  ;;  %p190_p8 = scmp.lt.s32.totalorder %s3049_s21, 3 }
   0xc   : > { %p191_p9 = pnand %p1970_p7, %p190_p8 }
   0xd   : > { %v224_v0 = vld [vmem:[%s4159_s1] sm:$0xf] (!%p191_p9)  ;;  %v3051_v2 = vmov (!%p191_p9), 0   ;;  %v1991_v4 = vld [vmem:[%s4162_s4 + $0x188] sm:$0xff] (!%p191_p9)  ;;  %v1992_v14 = vld [vmem:[%s4162_s4 + $0x190] sm:$0xff] (!%p191_p9)  ;;  %p218_p10 = scmp.lt.s32.totalorder (!%p191_p9), %s3107_s22, 1 }
   0xe   : > { %194 = sbr.rel (%p191_p9) target bundleno = 1398 (0x576), region = 40  ;;  %v1990_v1 = vld [vmem:[%s4162_s4 + $0x180] sm:$0xff] (!%p191_p9)  ;;  %2986 = vset.pattern.permute.xlu0 (!%p191_p9), %v3051_v2  ;;  %v270_v6 = vld [vmem:[%s4162_s4 + $0x88] sm:$0xff] (!%p191_p9)  ;;  %v1993_v15 = vld [vmem:[%s4162_s4 + $0x198] sm:$0xff] (!%p191_p9)  ;;  %vm3054_vm0 = vmmov (!%p191_p9), 0   ;;  %vm468_vm1 = vcmask (!%p191_p9), 1043456  }
   0xf   : > { %v225_v3 = vld [vmem:[%s4160_s2] sm:$0xf] (!%p191_p9)  ;;  %228 = vperm.xlu0 (!%p191_p9), %2986, %v224_v0   ;;  %v2671_v7 = vpack.c.bf16 (!%p191_p9), %v1991_v4, %v1990_v1  ;;  %v1975_v10 = vld [vmem:[%s4162_s4 + $0x108] sm:$0xff] (!%p191_p9)  ;;  %v2675_v17 = vpack.c.bf16 (!%p191_p9), %v1993_v15, %v1992_v14  ;;  %v271_v18 = vld [vmem:[%s4162_s4 + $0x90] sm:$0xff] (!%p191_p9)  ;;  %vm464_vm2 = vcmask (!%p191_p9), 31744   ;;  %s215_s16 = sand.u32 (!%p191_p9), 1, %s3041_s19  }
  0x10   : > { %v269_v5 = vld [vmem:[%s4162_s4 + $0x80] sm:$0xff] (!%p191_p9)  ;;  %v254_v13 = vld [vmem:[%s4162_s4 + $0x8] sm:$0xff] (!%p191_p9)  ;;  %v272_v19 = vld [vmem:[%s4162_s4 + $0x98] sm:$0xff] (!%p191_p9)  ;;  %s2257_s23 = sshll.u32 (!%p191_p9), %s3107_s22, 7  ;;  %vm1892_vm3 = vcmask (!%p191_p9), 523264   ;;  %s1895_s8 = scalar_lea.sflag (!%p191_p9), [#allocation3], %s215_s16 }
  0x11   : > { %v2639_v8 = vpack.c.bf16 (!%p191_p9), %v270_v6, %v269_v5  ;;  %v1974_v9 = vld [vmem:[%s4162_s4 + $0x100] sm:$0xff] (!%p191_p9)  ;;  %2672 = vmatprep.subr.bf16.mxu1 (!%p191_p9), %v2671_v7  ;;  %v1976_v20 = vld [vmem:[%s4162_s4 + $0x110] sm:$0xff] (!%p191_p9)  ;;  %v2643_v21 = vpack.c.bf16 (!%p191_p9), %v272_v19, %v271_v18  ;;  %v1977_v22 = vld [vmem:[%s4162_s4 + $0x118] sm:$0xff] (!%p191_p9)  ;;  %s4116_s7 = scalar_lea.hbm (!%p191_p9), %s4163_s5, %s2257_s23 }
  0x12   : > { %v253_v11 = vld [vmem:[%s4162_s4] sm:$0xff] (!%p191_p9)  ;;  %v2673_v12 = vpack.c.bf16 (!%p191_p9), %v1975_v10, %v1974_v9  ;;  %v255_v23 = vld [vmem:[%s4162_s4 + $0x10] sm:$0xff] (!%p191_p9)  ;;  %v256_v24 = vld [vmem:[%s4162_s4 + $0x18] sm:$0xff] (!%p191_p9)  ;;  %v2677_v25 = vpack.c.bf16 (!%p191_p9), %v1977_v22, %v1976_v20 }
  0x13   : > { %2640 = vmatprep.subr.bf16.mxu0 (!%p191_p9), %v2639_v8  ;;  %v2641_v16 = vpack.c.bf16 (!%p191_p9), %v254_v13, %v253_v11  ;;  %241 = vperm.xlu0 (!%p191_p9), %2986, %v225_v3   ;;  %v2645_v26 = vpack.c.bf16 (!%p191_p9), %v256_v24, %v255_v23  ;;  %v1994_v27 = vld [vmem:[%s4162_s4 + $0x1a0] sm:$0xff] (!%p191_p9)  ;;  %v1995_v28 = vld [vmem:[%s4162_s4 + $0x1a8] sm:$0xff] (!%p191_p9)  ;;  %v1996_v37 = vld [vmem:[%s4162_s4 + $0x1b0] sm:$0xff] (!%p191_p9) }
  0x14   : > { %2674 = vmatpush3.bf16.msra.mxu1 (!%p191_p9), %v2673_v12  ;;  %v273_v29 = vld [vmem:[%s4162_s4 + $0xa0] sm:$0xff] (!%p191_p9)  ;;  %v2679_v30 = vpack.c.bf16 (!%p191_p9), %v1995_v28, %v1994_v27  ;;  %v274_v31 = vld [vmem:[%s4162_s4 + $0xa8] sm:$0xff] (!%p191_p9)  ;;  %v1997_v39 = vld [vmem:[%s4162_s4 + $0x1b8] sm:$0xff] (!%p191_p9) }
  0x15   : > { %2642 = vmatpush3.bf16.msra.mxu0 %v2641_v16  ;;  %2676 = vmatprep.subr.bf16.mxu1 %v2675_v17  ;;  %v1978_v32 = vld [vmem:[%s4162_s4 + $0x120] sm:$0xff]  ;;  %v1979_v33 = vld [vmem:[%s4162_s4 + $0x128] sm:$0xff]  ;;  %v2647_v34 = vpack.c.bf16 %v274_v31, %v273_v29  ;;  %v275_v40 = vld [vmem:[%s4162_s4 + $0xb0] sm:$0xff]  ;;  %v2683_v43 = vpack.c.bf16 %v1997_v39, %v1996_v37  ;;  %s219_s13 = scalar_select %p218_p10, %s3107_s22, 1 }
  0x16   : > { %2644 = vmatprep.subr.bf16.mxu0 %v2643_v21  ;;  %v257_v35 = vld [vmem:[%s4162_s4 + $0x20] sm:$0xff]  ;;  %v258_v36 = vld [vmem:[%s4162_s4 + $0x28] sm:$0xff]  ;;  %v2681_v38 = vpack.c.bf16 %v1979_v33, %v1978_v32  ;;  %v276_v41 = vld [vmem:[%s4162_s4 + $0xb8] sm:$0xff]  ;;  %s3055_s22 = smov [#allocation2]  }
  0x17   : > { %v2649_v42 = vpack.c.bf16 %v258_v36, %v257_v35  ;;  %v1980_v44 = vld [vmem:[%s4162_s4 + $0x130] sm:$0xff]  ;;  %v1981_v45 = vld [vmem:[%s4162_s4 + $0x138] sm:$0xff]  ;;  %v2651_v47 = vpack.c.bf16 %v276_v41, %v275_v40  ;;  %v1998_v49 = vld [vmem:[%s4162_s4 + $0x1c0] sm:$0xff]  ;;  %v233_v40 = vlaneseq  ;;  %s2260_s14 = sshll.u32 %s219_s13, 3  ;;  %s2991_s10 = sshll.u32 %s3055_s22, 4  ;;  %s2992_s10 = int_to_ptr.vmem [resolvable:$false] %s2991_s10 }
  0x18   : > { %2678 = vmatpush3.bf16.msra.mxu1 %v2677_v25  ;;  %v259_v46 = vld [vmem:[%s4162_s4 + $0x30] sm:$0xff]  ;;  %v260_v48 = vld [vmem:[%s4162_s4 + $0x38] sm:$0xff]  ;;  %v1999_v50 = vld [vmem:[%s4162_s4 + $0x1c8] sm:$0xff]  ;;  %v2685_v53 = vpack.c.bf16 %v1981_v45, %v1980_v44  ;;  %s222_s17 = scalar_lea.vmem %s4158_s0, %s2260_s14  ;;  %s2993_s11 = scalar_lea.vmem %s2992_s10, 256 }
  0x19   : > { %2646 = vmatpush3.bf16.msra.mxu0 %v2645_v26  ;;  %2680 = vmatprep.subr.bf16.mxu1 %v2679_v30  ;;  %v277_v51 = vld [vmem:[%s4162_s4 + $0xc0] sm:$0xff]  ;;  %v278_v52 = vld [vmem:[%s4162_s4 + $0xc8] sm:$0xff]  ;;  %v2653_v54 = vpack.c.bf16 %v260_v48, %v259_v46  ;;  %v2687_v55 = vpack.c.bf16 %v1999_v50, %v1998_v49  ;;  %v2000_v61 = vld [vmem:[%s4162_s4 + $0x1d0] sm:$0xff] }
  0x1a   : > { %2648 = vmatprep.subr.bf16.mxu0 %v2647_v34  ;;  %v1982_v56 = vld [vmem:[%s4162_s4 + $0x140] sm:$0xff]  ;;  %v1983_v57 = vld [vmem:[%s4162_s4 + $0x148] sm:$0xff]  ;;  %v2655_v59 = vpack.c.bf16 %v278_v52, %v277_v51  ;;  %v2001_v62 = vld [vmem:[%s4162_s4 + $0x1d8] sm:$0xff] }
  0x1b   : > { %v261_v58 = vld [vmem:[%s4162_s4 + $0x40] sm:$0xff]  ;;  %v262_v60 = vld [vmem:[%s4162_s4 + $0x48] sm:$0xff]  ;;  %v279_v63 = vld [vmem:[%s4162_s4 + $0xd0] sm:$0xff]  ;;  %v2689_v1 = vpack.c.bf16 %v1983_v57, %v1982_v56  ;;  %v2691_v3 = vpack.c.bf16 %v2001_v62, %v2000_v61 }
  0x1c   : > { %2682 = vmatpush3.bf16.msra.mxu1 %v2681_v38  ;;  %v280_v0 = vld [vmem:[%s4162_s4 + $0xd8] sm:$0xff]  ;;  %v2657_v2 = vpack.c.bf16 %v262_v60, %v261_v58  ;;  %v1984_v4 = vld [vmem:[%s4162_s4 + $0x150] sm:$0xff]  ;;  %v2002_v9 = vld [vmem:[%s4162_s4 + $0x1e0] sm:$0xff]  ;;  %v3052_v38 = vmov 839922192  }
  0x1d   : > { %2650 = vmatpush3.bf16.msra.mxu0 %v2649_v42  ;;  %2684 = vmatprep.subr.bf16.mxu1 %v2683_v43  ;;  %v1985_v5 = vld [vmem:[%s4162_s4 + $0x158] sm:$0xff]  ;;  %v263_v6 = vld [vmem:[%s4162_s4 + $0x50] sm:$0xff]  ;;  %v2659_v7 = vpack.c.bf16 %v280_v0, %v279_v63  ;;  %v2003_v10 = vld [vmem:[%s4162_s4 + $0x1e8] sm:$0xff]  ;;  %v231_v39 = vunpack.c.l.s4 %v3052_v38  ;;  %v234_v42 = vshrl.u32 %v233_v40, 7 }
  0x1e   : > { %2652 = vmatprep.subr.bf16.mxu0 %v2651_v47  ;;  %v264_v8 = vld [vmem:[%s4162_s4 + $0x58] sm:$0xff]  ;;  %v281_v11 = vld [vmem:[%s4162_s4 + $0xe0] sm:$0xff]  ;;  %v282_v12 = vld [vmem:[%s4162_s4 + $0xe8] sm:$0xff]  ;;  %v2693_v13 = vpack.c.bf16 %v1985_v5, %v1984_v4  ;;  %v2695_v15 = vpack.c.bf16 %v2003_v10, %v2002_v9 }
  0x1f   : > { %v2661_v14 = vpack.c.bf16 %v264_v8, %v263_v6  ;;  %v1986_v16 = vld [vmem:[%s4162_s4 + $0x160] sm:$0xff]  ;;  %v1987_v17 = vld [vmem:[%s4162_s4 + $0x168] sm:$0xff]  ;;  %v2663_v19 = vpack.c.bf16 %v282_v12, %v281_v11  ;;  %v2004_v21 = vld [vmem:[%s4162_s4 + $0x1f0] sm:$0xff]  ;;  %v232_v41 = vunpack.c.0.s8 %v231_v39 }
  0x20   : > { %2686 = vmatpush3.bf16.msra.mxu1 %v2685_v53  ;;  %v265_v18 = vld [vmem:[%s4162_s4 + $0x60] sm:$0xff]  ;;  %v266_v20 = vld [vmem:[%s4162_s4 + $0x68] sm:$0xff]  ;;  %v2005_v22 = vld [vmem:[%s4162_s4 + $0x1f8] sm:$0xff]  ;;  %v2697_v25 = vpack.c.bf16 %v1987_v17, %v1986_v16 }
  0x21   : > { %2654 = vmatpush3.bf16.msra.mxu0 %v2653_v54  ;;  %2688 = vmatprep.subr.bf16.mxu1 %v2687_v55  ;;  %v283_v23 = vld [vmem:[%s4162_s4 + $0xf0] sm:$0xff]  ;;  %v284_v24 = vld [vmem:[%s4162_s4 + $0xf8] sm:$0xff]  ;;  %v2665_v26 = vpack.c.bf16 %v266_v20, %v265_v18  ;;  %v2699_v27 = vpack.c.bf16 %v2005_v22, %v2004_v21  ;;  %v2027_v33 = vld [vmem:[%s4162_s4 + $0x280] sm:$0xff]  ;;  %v235_v43 = vsub.s32 %v232_v41, %v234_v42 }
  0x22   : > { %2656 = vmatprep.subr.bf16.mxu0 %v2655_v59  ;;  %v1988_v28 = vld [vmem:[%s4162_s4 + $0x170] sm:$0xff]  ;;  %v1989_v29 = vld [vmem:[%s4162_s4 + $0x178] sm:$0xff]  ;;  %v2667_v31 = vpack.c.bf16 %v284_v24, %v283_v23  ;;  %v2028_v34 = vld [vmem:[%s4162_s4 + $0x288] sm:$0xff] }
  0x23   : > { %v267_v30 = vld [vmem:[%s4162_s4 + $0x70] sm:$0xff]  ;;  %v268_v32 = vld [vmem:[%s4162_s4 + $0x78] sm:$0xff]  ;;  %v2701_v35 = vpack.c.bf16 %v1989_v29, %v1988_v28  ;;  %v2703_v37 = vpack.c.bf16 %v2028_v34, %v2027_v33  ;;  %v223_v46 = vld [vmem:[%s222_s17] sm:$0xff]  ;;  %s1971_s17 = sshll.u32 %s215_s16, 3 }
  0x24   : > { %2690 = vmatpush3.bf16.msra.mxu1 %v2689_v1  ;;  %v2669_v36 = vpack.c.bf16 %v268_v32, %v267_v30  ;;  %v2011_v51 = vld [vmem:[%s4162_s4 + $0x200] sm:$0xff]  ;;  %v2012_v52 = vld [vmem:[%s4162_s4 + $0x208] sm:$0xff]  ;;  %v2029_v54 = vld [vmem:[%s4162_s4 + $0x290] sm:$0xff]  ;;  %s217_s25 = scalar_lea.vmem [#allocation2], %s1971_s17 }
  0x25   : > { %2658 = vmatpush3.bf16.msra.mxu0 %v2657_v2  ;;  %2692 = vmatprep.subr.bf16.mxu1 %v2691_v3  ;;  %v2030_v55 = vld [vmem:[%s4162_s4 + $0x298] sm:$0xff]  ;;  %v2705_v57 = vpack.c.bf16 %v2012_v52, %v2011_v51  ;;  %v2013_v59 = vld [vmem:[%s4162_s4 + $0x210] sm:$0xff]  ;;  %v2031_v61 = vld [vmem:[%s4162_s4 + $0x2a0] sm:$0xff]  ;;  %s1908_s26 = sshll.u32 %s217_s25, 4  ;;  %s4118_s26 = int_to_ptr.vmem [resolvable:$true] %s1908_s26 }
  0x26   : > { %2660 = vmatprep.subr.bf16.mxu0 %v2659_v7  ;;  %v2707_v58 = vpack.c.bf16 %v2030_v55, %v2029_v54  ;;  %v2014_v60 = vld [vmem:[%s4162_s4 + $0x218] sm:$0xff]  ;;  %v2032_v62 = vld [vmem:[%s4162_s4 + $0x2a8] sm:$0xff]  ;;  %v2015_v1 = vld [vmem:[%s4162_s4 + $0x220] sm:$0xff]  ;;  %s2987_s9 = scalar_lea.vmem %s4118_s26, 128  ;;  %p2994_p0 = scmp.lt.s32.totalorder %s4118_s26, %s2992_s10 }
  0x27   : > { %v2709_v63 = vpack.c.bf16 %v2014_v60, %v2013_v59  ;;  %v2711_v0 = vpack.c.bf16 %v2032_v62, %v2031_v61  ;;  %v2016_v2 = vld [vmem:[%s4162_s4 + $0x228] sm:$0xff]  ;;  %v2033_v3 = vld [vmem:[%s4162_s4 + $0x2b0] sm:$0xff]  ;;  %v2034_v4 = vld [vmem:[%s4162_s4 + $0x2b8] sm:$0xff]  ;;  %p2988_p11 = scmp.ne.s32.totalorder %s4118_s26, %s2987_s9  ;;  %p2995_p1 = scmp.lt.s32.totalorder %s2993_s11, %s2987_s9 }
  0x28   : > { %2694 = vmatpush3.bf16.msra.mxu1 %v2693_v13  ;;  %v2713_v5 = vpack.c.bf16 %v2016_v2, %v2015_v1  ;;  %v2715_v6 = vpack.c.bf16 %v2034_v4, %v2033_v3  ;;  %v2017_v7 = vld [vmem:[%s4162_s4 + $0x230] sm:$0xff]  ;;  %v2018_v8 = vld [vmem:[%s4162_s4 + $0x238] sm:$0xff]  ;;  %v2035_v9 = vld [vmem:[%s4162_s4 + $0x2c0] sm:$0xff] }
  0x29   : > { %2662 = vmatpush3.bf16.msra.mxu0 %v2661_v14  ;;  %2696 = vmatprep.subr.bf16.mxu1 %v2695_v15  ;;  %v2036_v10 = vld [vmem:[%s4162_s4 + $0x2c8] sm:$0xff]  ;;  %v2717_v11 = vpack.c.bf16 %v2018_v8, %v2017_v7  ;;  %v2019_v13 = vld [vmem:[%s4162_s4 + $0x240] sm:$0xff]  ;;  %v2037_v15 = vld [vmem:[%s4162_s4 + $0x2d0] sm:$0xff]  ;;  %p2989_p12 = pnand %p2988_p11, %p3124_p5  ;;  %p2996_p2 = por %p2995_p1, %p2994_p0 }
  0x2a   : > { %2664 = vmatprep.subr.bf16.mxu0 %v2663_v19  ;;  %v2719_v12 = vpack.c.bf16 %v2036_v10, %v2035_v9  ;;  %v2020_v14 = vld [vmem:[%s4162_s4 + $0x248] sm:$0xff]  ;;  %v2038_v16 = vld [vmem:[%s4162_s4 + $0x2d8] sm:$0xff]  ;;  %v2021_v19 = vld [vmem:[%s4162_s4 + $0x250] sm:$0xff] }
  0x2b   : > { %v2721_v17 = vpack.c.bf16 %v2020_v14, %v2019_v13  ;;  %v2723_v18 = vpack.c.bf16 %v2038_v16, %v2037_v15  ;;  %v2022_v20 = vld [vmem:[%s4162_s4 + $0x258] sm:$0xff]  ;;  %v2039_v21 = vld [vmem:[%s4162_s4 + $0x2e0] sm:$0xff]  ;;  %v2040_v22 = vld [vmem:[%s4162_s4 + $0x2e8] sm:$0xff]  ;;  %p2990_p13 = pneg %p2989_p12 }
  0x2c   : > { %2698 = vmatpush3.bf16.msra.mxu1 %v2697_v25  ;;  %v2725_v23 = vpack.c.bf16 %v2022_v20, %v2021_v19  ;;  %v2727_v24 = vpack.c.bf16 %v2040_v22, %v2039_v21  ;;  %v2023_v25 = vld [vmem:[%s4162_s4 + $0x260] sm:$0xff]  ;;  %v2042_v28 = vld [vmem:[%s4162_s4 + $0x2f8] sm:$0xff]  ;;  %v2098_v34 = vld [vmem:[%s4162_s4 + $0x488] sm:$0xff] }
  0x2d   : > { %2666 = vmatpush3.bf16.msra.mxu0 %v2665_v26  ;;  %2700 = vmatprep.subr.bf16.mxu1 %v2699_v27  ;;  %v2024_v26 = vld [vmem:[%s4162_s4 + $0x268] sm:$0xff]  ;;  %v2041_v27 = vld [vmem:[%s4162_s4 + $0x2f0] sm:$0xff]  ;;  %v2026_v32 = vld [vmem:[%s4162_s4 + $0x278] sm:$0xff]  ;;  %p2997_p3 = pnand %p2996_p2, %p2990_p13 }
  0x2e   : > { %2668 = vmatprep.subr.bf16.mxu0 %v2667_v31  ;;  %v2729_v29 = vpack.c.bf16 %v2024_v26, %v2023_v25  ;;  %v2731_v30 = vpack.c.bf16 %v2042_v28, %v2041_v27  ;;  %v2025_v31 = vld [vmem:[%s4162_s4 + $0x270] sm:$0xff]  ;;  %v2097_v33 = vld [vmem:[%s4162_s4 + $0x480] sm:$0xff]  ;;  %v2082_v38 = vld [vmem:[%s4162_s4 + $0x408] sm:$0xff] }
  0x2f   : > { %v2099_v39 = vld [vmem:[%s4162_s4 + $0x490] sm:$0xff]  ;;  %v2100_v40 = vld [vmem:[%s4162_s4 + $0x498] sm:$0xff]  ;;  %v2105_v59 = vld [vmem:[%s4162_s4 + $0x4c0] sm:$0xff] }
  0x30   : > { %2702 = vmatpush3.bf16.msra.mxu1 %v2701_v35  ;;  %v2733_v35 = vpack.c.bf16 %v2026_v32, %v2025_v31  ;;  %v2771_v42 = vpack.c.bf16 %v2100_v40, %v2099_v39  ;;  %v2103_v51 = vld [vmem:[%s4162_s4 + $0x4b0] sm:$0xff]  ;;  %v2104_v52 = vld [vmem:[%s4162_s4 + $0x4b8] sm:$0xff]  ;;  %v2106_v60 = vld [vmem:[%s4162_s4 + $0x4c8] sm:$0xff] }
  0x31   : > { %2670 = vmatpush3.bf16.msra.mxu0 %v2669_v36  ;;  %2704 = vmatprep.subr.bf16.mxu1 %v2703_v37  ;;  %v2767_v36 = vpack.c.bf16 %v2098_v34, %v2097_v33  ;;  %v2081_v37 = vld [vmem:[%s4162_s4 + $0x400] sm:$0xff]  ;;  %v2779_v55 = vpack.c.bf16 %v2104_v52, %v2103_v51  ;;  %v2783_v62 = vpack.c.bf16 %v2106_v60, %v2105_v59  ;;  %v2107_v1 = vld [vmem:[%s4162_s4 + $0x4d0] sm:$0xff]  ;;  %v2108_v2 = vld [vmem:[%s4162_s4 + $0x4d8] sm:$0xff] }
  0x32   : > { %v2769_v41 = vpack.c.bf16 %v2082_v38, %v2081_v37  ;;  %v2787_v4 = vpack.c.bf16 %v2108_v2, %v2107_v1  ;;  %v2109_v7 = vld [vmem:[%s4162_s4 + $0x4e0] sm:$0xff]  ;;  %v2110_v8 = vld [vmem:[%s4162_s4 + $0x4e8] sm:$0xff]  ;;  %v2111_v13 = vld [vmem:[%s4162_s4 + $0x4f0] sm:$0xff] }
  0x33   : > { %v2791_v10 = vpack.c.bf16 %v2110_v8, %v2109_v7  ;;  %v2112_v14 = vld [vmem:[%s4162_s4 + $0x4f8] sm:$0xff]  ;;  %v2167_v19 = vld [vmem:[%s4162_s4 + $0x680] sm:$0xff]  ;;  %v2168_v20 = vld [vmem:[%s4162_s4 + $0x688] sm:$0xff] }
  0x34   : > { %v2795_v16 = vpack.c.bf16 %v2112_v14, %v2111_v13  ;;  %v2831_v22 = vpack.c.bf16 %v2168_v20, %v2167_v19  ;;  %v2169_v25 = vld [vmem:[%s4162_s4 + $0x690] sm:$0xff]  ;;  %v2170_v26 = vld [vmem:[%s4162_s4 + $0x698] sm:$0xff]  ;;  %v2171_v31 = vld [vmem:[%s4162_s4 + $0x6a0] sm:$0xff] }
  0x35   : > { %v2835_v28 = vpack.c.bf16 %v2170_v26, %v2169_v25  ;;  %v2172_v32 = vld [vmem:[%s4162_s4 + $0x6a8] sm:$0xff]  ;;  %v2173_v37 = vld [vmem:[%s4162_s4 + $0x6b0] sm:$0xff]  ;;  %v2174_v38 = vld [vmem:[%s4162_s4 + $0x6b8] sm:$0xff] }
  0x36   : > { %v2839_v34 = vpack.c.bf16 %v2172_v32, %v2171_v31  ;;  %v2843_v40 = vpack.c.bf16 %v2174_v38, %v2173_v37  ;;  %v2238_v7 = vld [vmem:[%s4162_s4 + $0x888] sm:$0xff]  ;;  %v2240_v13 = vld [vmem:[%s4162_s4 + $0x898] sm:$0xff] }
  0x37   : > { %v2242_v19 = vld [vmem:[%s4162_s4 + $0x8a8] sm:$0xff]  ;;  %v2244_v25 = vld [vmem:[%s4162_s4 + $0x8b8] sm:$0xff] }
  0x38   : > { %v2246_v31 = vld [vmem:[%s4162_s4 + $0x8c8] sm:$0xff]  ;;  %v2248_v37 = vld [vmem:[%s4162_s4 + $0x8d8] sm:$0xff] }
  0x8e   : > { %v229_v44 = vpop.permute.xlu0 %228 }
  0x8f   : > { %v236_v45 = vrot.slane %v229_v44, %v235_v43  ;;  %v2084_v44 = vld [vmem:[%s4162_s4 + $0x418] sm:$0xff] }
  0x91   : > { %v238_v48 = vmul.f32 %v236_v45, %v223_v46  ;;  %v2101_v45 = vld [vmem:[%s4162_s4 + $0x4a0] sm:$0xff]  ;;  %v2102_v46 = vld [vmem:[%s4162_s4 + $0x4a8] sm:$0xff] }
  0x92   : > { %v242_v47 = vpop.permute.xlu0 %241 }
  0x93   : > { %v249_v49 = vrot.slane %v242_v47, %v235_v43  ;;  %v2083_v43 = vld [vmem:[%s4162_s4 + $0x410] sm:$0xff] }
  0x94   : > { %v2773_v47 = vpack.c.bf16 %v2084_v44, %v2083_v43  ;;  %v2175_v43 = vld [vmem:[%s4162_s4 + $0x6c0] sm:$0xff]  ;;  %v2176_v44 = vld [vmem:[%s4162_s4 + $0x6c8] sm:$0xff] }
  0x95   : > { %v251_v50 = vadd.f32 %v249_v49, %v238_v48  ;;  %v2775_v48 = vpack.c.bf16 %v2102_v46, %v2101_v45  ;;  %v2085_v49 = vld [vmem:[%s4162_s4 + $0x420] sm:$0xff]  ;;  %v2847_v46 = vpack.c.bf16 %v2176_v44, %v2175_v43  ;;  %v2250_v43 = vld [vmem:[%s4162_s4 + $0x8e8] sm:$0xff] }
  0x97   : > { %v3349_v53 = vmax.f32 %v251_v50, 0.0  ;;  %v2086_v50 = vld [vmem:[%s4162_s4 + $0x428] sm:$0xff] }
  0x98   : > { %v2777_v54 = vpack.c.bf16 %v2086_v50, %v2085_v49  ;;  %v2177_v49 = vld [vmem:[%s4162_s4 + $0x6d0] sm:$0xff]  ;;  %v2178_v50 = vld [vmem:[%s4162_s4 + $0x6d8] sm:$0xff] }
  0x99   : > { %v3359_v56 = vcombine.high %v3349_v53, %v3349_v53  ;;  %v2851_v52 = vpack.c.bf16 %v2178_v50, %v2177_v49  ;;  %v2252_v49 = vld [vmem:[%s4162_s4 + $0x8f8] sm:$0xff] }
  0x9b   : > { %352 = vmatprep.mubr.f32.mxu0 %v3359_v56  ;;  %456 = vmatprep.mubr.f32.mxu1 %v3359_v56 }
  0x9c   : > { %353 = vmatmul.mubr.f32.vlgmr.msra.gmra.mrb[0].mxu0 %v3349_v53  ;;  %457 = vmatmul.mubr.f32.vlgmr.msra.gmra.mrb[0].mxu1 %v3349_v53 }
  0x9d   : > { %2706 = vmatpush3.bf16.msra.mxu1 %v2705_v57  ;;  %715 = vmatprep.mubr.f32.mxu1 %v3359_v56  ;;  %v2087_v57 = vld [vmem:[%s4162_s4 + $0x430] sm:$0xff] }
  0x9e   : > { %2708 = vmatprep.subr.bf16.mxu1 %v2707_v58  ;;  %v2088_v58 = vld [vmem:[%s4162_s4 + $0x438] sm:$0xff] }
  0x9f   : > { %v2781_v61 = vpack.c.bf16 %v2088_v58, %v2087_v57  ;;  %v2179_v57 = vld [vmem:[%s4162_s4 + $0x6e0] sm:$0xff]  ;;  %v2180_v58 = vld [vmem:[%s4162_s4 + $0x6e8] sm:$0xff] }
  0xa0   : > { %v2855_v60 = vpack.c.bf16 %v2180_v58, %v2179_v57 }
  0xa1   : > { %2710 = vmatpush3.bf16.msra.mxu1 %v2709_v63  ;;  %v2089_v63 = vld [vmem:[%s4162_s4 + $0x440] sm:$0xff] }
  0xa2   : > { %2712 = vmatprep.subr.bf16.mxu1 %v2711_v0  ;;  %v2090_v0 = vld [vmem:[%s4162_s4 + $0x448] sm:$0xff] }
  0xa3   : > { %v2785_v3 = vpack.c.bf16 %v2090_v0, %v2089_v63  ;;  %v2181_v63 = vld [vmem:[%s4162_s4 + $0x6f0] sm:$0xff]  ;;  %v2182_v0 = vld [vmem:[%s4162_s4 + $0x6f8] sm:$0xff] }
  0xa4   : > { %v2859_v2 = vpack.c.bf16 %v2182_v0, %v2181_v63  ;;  %v2006_v63 = vld [vmem:[%s4161_s3 + $0x8] sm:$0xff]  ;;  %v358_v0 = vld [vmem:[%s4161_s3] sm:$0xff] }
  0xa5   : > { %2714 = vmatpush3.bf16.msra.mxu1 %v2713_v5  ;;  %v2091_v5 = vld [vmem:[%s4162_s4 + $0x450] sm:$0xff] }
  0xa6   : > { %2716 = vmatprep.subr.bf16.mxu1 %v2715_v6  ;;  %v2092_v6 = vld [vmem:[%s4162_s4 + $0x458] sm:$0xff] }
  0xa7   : > { %v2789_v9 = vpack.c.bf16 %v2092_v6, %v2091_v5  ;;  %v3053_v5 = vmov 0.0   ;;  %v2237_v6 = vld [vmem:[%s4162_s4 + $0x880] sm:$0xff] }
  0xa8   : > { %2594 = vmatprep.subr.mxu0 %v3053_v5  ;;  %2596 = vmatprep.mubr.msk.f32.mxu0 %vm3054_vm0, %v3053_v5 }
  0xa9   : > { %2718 = vmatpush3.bf16.msra.mxu1 %v2717_v11  ;;  %v2093_v11 = vld [vmem:[%s4162_s4 + $0x460] sm:$0xff] }
  0xaa   : > { %2720 = vmatprep.subr.bf16.mxu1 %v2719_v12  ;;  %v2094_v12 = vld [vmem:[%s4162_s4 + $0x468] sm:$0xff] }
  0xab   : > { %v2793_v15 = vpack.c.bf16 %v2094_v12, %v2093_v11  ;;  %v2222_v11 = vld [vmem:[%s4162_s4 + $0x808] sm:$0xff]  ;;  %v2239_v12 = vld [vmem:[%s4162_s4 + $0x890] sm:$0xff] }
  0xad   : > { %2722 = vmatpush3.bf16.msra.mxu1 %v2721_v17  ;;  %v2095_v17 = vld [vmem:[%s4162_s4 + $0x470] sm:$0xff] }
  0xae   : > { %2724 = vmatprep.subr.bf16.mxu1 %v2723_v18  ;;  %v2096_v18 = vld [vmem:[%s4162_s4 + $0x478] sm:$0xff] }
  0xaf   : > { %v2797_v21 = vpack.c.bf16 %v2096_v18, %v2095_v17  ;;  %v2224_v17 = vld [vmem:[%s4162_s4 + $0x818] sm:$0xff]  ;;  %v2241_v18 = vld [vmem:[%s4162_s4 + $0x8a0] sm:$0xff] }
  0xb1   : > { %2726 = vmatpush3.bf16.msra.mxu1 %v2725_v23  ;;  %v2151_v23 = vld [vmem:[%s4162_s4 + $0x600] sm:$0xff] }
  0xb2   : > { %2728 = vmatprep.subr.bf16.mxu1 %v2727_v24  ;;  %v2152_v24 = vld [vmem:[%s4162_s4 + $0x608] sm:$0xff] }
  0xb3   : > { %v2833_v27 = vpack.c.bf16 %v2152_v24, %v2151_v23  ;;  %v2226_v23 = vld [vmem:[%s4162_s4 + $0x828] sm:$0xff]  ;;  %v2243_v24 = vld [vmem:[%s4162_s4 + $0x8b0] sm:$0xff] }
  0xb5   : > { %2730 = vmatpush3.bf16.msra.mxu1 %v2729_v29  ;;  %v2153_v29 = vld [vmem:[%s4162_s4 + $0x610] sm:$0xff] }
  0xb6   : > { %2732 = vmatprep.subr.bf16.mxu1 %v2731_v30  ;;  %v2154_v30 = vld [vmem:[%s4162_s4 + $0x618] sm:$0xff] }
  0xb7   : > { %v2837_v33 = vpack.c.bf16 %v2154_v30, %v2153_v29  ;;  %v2228_v29 = vld [vmem:[%s4162_s4 + $0x838] sm:$0xff]  ;;  %v2245_v30 = vld [vmem:[%s4162_s4 + $0x8c0] sm:$0xff] }
  0xb9   : > { %2734 = vmatpush3.bf16.msra.mxu1 %v2733_v35  ;;  %v2155_v35 = vld [vmem:[%s4162_s4 + $0x620] sm:$0xff] }
  0xba   : > { %2768 = vmatprep.subr.bf16.mxu1 %v2767_v36  ;;  %v2156_v36 = vld [vmem:[%s4162_s4 + $0x628] sm:$0xff] }
  0xbb   : > { %v2841_v39 = vpack.c.bf16 %v2156_v36, %v2155_v35  ;;  %v2230_v35 = vld [vmem:[%s4162_s4 + $0x848] sm:$0xff]  ;;  %v2247_v36 = vld [vmem:[%s4162_s4 + $0x8d0] sm:$0xff] }
  0xbc   : > { %716 = vmatmul.mubr.f32.vlgmr.msra.gmra.mrb[2].mxu1 %v3349_v53 }
  0xbd   : > { %2770 = vmatpush3.bf16.msra.mxu1 %v2769_v41  ;;  %1079 = vmatprep.mubr.f32.mxu1 %v3359_v56  ;;  %v2157_v41 = vld [vmem:[%s4162_s4 + $0x630] sm:$0xff] }
  0xbe   : > { %2772 = vmatprep.subr.bf16.mxu1 %v2771_v42  ;;  %v2158_v42 = vld [vmem:[%s4162_s4 + $0x638] sm:$0xff] }
  0xbf   : > { %v2845_v45 = vpack.c.bf16 %v2158_v42, %v2157_v41  ;;  %v2232_v41 = vld [vmem:[%s4162_s4 + $0x858] sm:$0xff]  ;;  %v2249_v42 = vld [vmem:[%s4162_s4 + $0x8e0] sm:$0xff] }
  0xc1   : > { %2774 = vmatpush3.bf16.msra.mxu1 %v2773_v47  ;;  %v2159_v47 = vld [vmem:[%s4162_s4 + $0x640] sm:$0xff] }
  0xc2   : > { %2776 = vmatprep.subr.bf16.mxu1 %v2775_v48  ;;  %v2160_v48 = vld [vmem:[%s4162_s4 + $0x648] sm:$0xff] }
  0xc3   : > { %v2849_v51 = vpack.c.bf16 %v2160_v48, %v2159_v47  ;;  %v2234_v47 = vld [vmem:[%s4162_s4 + $0x868] sm:$0xff]  ;;  %v2251_v48 = vld [vmem:[%s4162_s4 + $0x8f0] sm:$0xff] }
  0xc5   : > { %2778 = vmatpush3.bf16.msra.mxu1 %v2777_v54  ;;  %v2161_v54 = vld [vmem:[%s4162_s4 + $0x650] sm:$0xff] }
  0xc6   : > { %2780 = vmatprep.subr.bf16.mxu1 %v2779_v55  ;;  %v2162_v55 = vld [vmem:[%s4162_s4 + $0x658] sm:$0xff] }
  0xc7   : > { %v2853_v59 = vpack.c.bf16 %v2162_v55, %v2161_v54  ;;  %v2236_v54 = vld [vmem:[%s4162_s4 + $0x878] sm:$0xff] }
  0xc9   : > { %2782 = vmatpush3.bf16.msra.mxu1 %v2781_v61  ;;  %v2163_v61 = vld [vmem:[%s4162_s4 + $0x660] sm:$0xff] }
  0xca   : > { %2784 = vmatprep.subr.bf16.mxu1 %v2783_v62  ;;  %v2164_v62 = vld [vmem:[%s4162_s4 + $0x668] sm:$0xff] }
  0xcb   : > { %v2857_v1 = vpack.c.bf16 %v2164_v62, %v2163_v61 }
  0xcd   : > { %2786 = vmatpush3.bf16.msra.mxu1 %v2785_v3  ;;  %v2165_v3 = vld [vmem:[%s4162_s4 + $0x670] sm:$0xff] }
  0xce   : > { %2788 = vmatprep.subr.bf16.mxu1 %v2787_v4  ;;  %v2166_v4 = vld [vmem:[%s4162_s4 + $0x678] sm:$0xff] }
  0xcf   : > { %v2861_v8 = vpack.c.bf16 %v2166_v4, %v2165_v3  ;;  %v2046_v3 = vld [vmem:[%s4162_s4 + $0x300] sm:$0xff]  ;;  %v2047_v4 = vld [vmem:[%s4162_s4 + $0x308] sm:$0xff] }
  0xd1   : > { %2790 = vmatpush3.bf16.msra.mxu1 %v2789_v9  ;;  %v2895_v9 = vpack.c.bf16 %v2238_v7, %v2237_v6  ;;  %v2064_v7 = vld [vmem:[%s4162_s4 + $0x390] sm:$0xff] }
  0xd2   : > { %2792 = vmatprep.subr.bf16.mxu1 %v2791_v10  ;;  %v2221_v10 = vld [vmem:[%s4162_s4 + $0x800] sm:$0xff] }
  0xd3   : > { %v2897_v14 = vpack.c.bf16 %v2222_v11, %v2221_v10 }
  0xd5   : > { %2794 = vmatpush3.bf16.msra.mxu1 %v2793_v15  ;;  %v2899_v15 = vpack.c.bf16 %v2240_v13, %v2239_v12  ;;  %v2043_v12 = vld [vmem:[%s4161_s3 + $0x10] sm:$0xff]  ;;  %v2737_v13 = vpack.c.bf16 %v2047_v4, %v2046_v3  ;;  %v2133_v3 = vld [vmem:[%s4162_s4 + $0x588] sm:$0xff] }
  0xd6   : > { %2796 = vmatprep.subr.bf16.mxu1 %v2795_v16  ;;  %v2223_v16 = vld [vmem:[%s4162_s4 + $0x810] sm:$0xff] }
  0xd7   : > { %v2901_v20 = vpack.c.bf16 %v2224_v17, %v2223_v16  ;;  %v2049_v16 = vld [vmem:[%s4162_s4 + $0x318] sm:$0xff]  ;;  %v2066_v17 = vld [vmem:[%s4162_s4 + $0x3a0] sm:$0xff] }
  0xd9   : > { %2798 = vmatpush3.bf16.msra.mxu1 %v2797_v21  ;;  %v2903_v21 = vpack.c.bf16 %v2242_v19, %v2241_v18  ;;  %v2067_v18 = vld [vmem:[%s4162_s4 + $0x3a8] sm:$0xff] }
  0xda   : > { %2832 = vmatprep.subr.bf16.mxu1 %v2831_v22  ;;  %v2225_v22 = vld [vmem:[%s4162_s4 + $0x820] sm:$0xff] }
  0xdb   : > { %v2905_v26 = vpack.c.bf16 %v2226_v23, %v2225_v22  ;;  %v2051_v22 = vld [vmem:[%s4162_s4 + $0x328] sm:$0xff]  ;;  %v2068_v23 = vld [vmem:[%s4162_s4 + $0x3b0] sm:$0xff] }
  0xdc   : > { %1080 = vmatmul.mubr.f32.vlgmr.msra.gmra.mrb[4].mxu1 %v3349_v53 }
  0xdd   : > { %2834 = vmatpush3.bf16.msra.mxu1 %v2833_v27  ;;  %1443 = vmatprep.mubr.f32.mxu1 %v3359_v56  ;;  %v2907_v27 = vpack.c.bf16 %v2244_v25, %v2243_v24  ;;  %v2069_v24 = vld [vmem:[%s4162_s4 + $0x3b8] sm:$0xff] }
  0xde   : > { %2836 = vmatprep.subr.bf16.mxu1 %v2835_v28  ;;  %v2227_v28 = vld [vmem:[%s4162_s4 + $0x830] sm:$0xff] }
  0xdf   : > { %v2909_v32 = vpack.c.bf16 %v2228_v29, %v2227_v28  ;;  %v2053_v28 = vld [vmem:[%s4162_s4 + $0x338] sm:$0xff]  ;;  %v2070_v29 = vld [vmem:[%s4162_s4 + $0x3c0] sm:$0xff] }
  0xe1   : > { %2838 = vmatpush3.bf16.msra.mxu1 %v2837_v33  ;;  %v2911_v33 = vpack.c.bf16 %v2246_v31, %v2245_v30  ;;  %v2071_v30 = vld [vmem:[%s4162_s4 + $0x3c8] sm:$0xff] }
  0xe2   : > { %2840 = vmatprep.subr.bf16.mxu1 %v2839_v34  ;;  %v2229_v34 = vld [vmem:[%s4162_s4 + $0x840] sm:$0xff] }
  0xe3   : > { %v2913_v38 = vpack.c.bf16 %v2230_v35, %v2229_v34  ;;  %v2055_v34 = vld [vmem:[%s4162_s4 + $0x348] sm:$0xff]  ;;  %v2072_v35 = vld [vmem:[%s4162_s4 + $0x3d0] sm:$0xff] }
  0xe5   : > { %2842 = vmatpush3.bf16.msra.mxu1 %v2841_v39  ;;  %v2915_v39 = vpack.c.bf16 %v2248_v37, %v2247_v36  ;;  %v2073_v36 = vld [vmem:[%s4162_s4 + $0x3d8] sm:$0xff] }
  0xe6   : > { %2844 = vmatprep.subr.bf16.mxu1 %v2843_v40  ;;  %v2231_v40 = vld [vmem:[%s4162_s4 + $0x850] sm:$0xff] }
  0xe7   : > { %v2917_v44 = vpack.c.bf16 %v2232_v41, %v2231_v40  ;;  %v2057_v40 = vld [vmem:[%s4162_s4 + $0x358] sm:$0xff]  ;;  %v2074_v41 = vld [vmem:[%s4162_s4 + $0x3e0] sm:$0xff] }
  0xe9   : > { %2846 = vmatpush3.bf16.msra.mxu1 %v2845_v45  ;;  %v2919_v45 = vpack.c.bf16 %v2250_v43, %v2249_v42  ;;  %v2075_v42 = vld [vmem:[%s4162_s4 + $0x3e8] sm:$0xff] }
  0xea   : > { %2848 = vmatprep.subr.bf16.mxu1 %v2847_v46  ;;  %v2233_v46 = vld [vmem:[%s4162_s4 + $0x860] sm:$0xff] }
  0xeb   : > { %v2921_v50 = vpack.c.bf16 %v2234_v47, %v2233_v46  ;;  %v2059_v46 = vld [vmem:[%s4162_s4 + $0x368] sm:$0xff]  ;;  %v2076_v47 = vld [vmem:[%s4162_s4 + $0x3f0] sm:$0xff] }
  0xed   : > { %2850 = vmatpush3.bf16.msra.mxu1 %v2849_v51  ;;  %v2923_v51 = vpack.c.bf16 %v2252_v49, %v2251_v48  ;;  %v2077_v48 = vld [vmem:[%s4162_s4 + $0x3f8] sm:$0xff] }
  0xee   : > { %2852 = vmatprep.subr.bf16.mxu1 %v2851_v52  ;;  %v2235_v52 = vld [vmem:[%s4162_s4 + $0x870] sm:$0xff] }
  0xef   : > { %v2925_v55 = vpack.c.bf16 %v2236_v54, %v2235_v52  ;;  %v2061_v52 = vld [vmem:[%s4162_s4 + $0x378] sm:$0xff] }
  0xf1   : > { %2854 = vmatpush3.bf16.msra.mxu1 %v2853_v59 }
  0xf2   : > { %2856 = vmatprep.subr.bf16.mxu1 %v2855_v60 }
  0xf5   : > { %2858 = vmatpush3.bf16.msra.mxu1 %v2857_v1  ;;  %v2062_v1 = vld [vmem:[%s4162_s4 + $0x380] sm:$0xff] }
  0xf6   : > { %2860 = vmatprep.subr.bf16.mxu1 %v2859_v2  ;;  %v2063_v2 = vld [vmem:[%s4162_s4 + $0x388] sm:$0xff] }
  0xf7   : > { %v2735_v10 = vpack.c.bf16 %v2063_v2, %v2062_v1  ;;  %v2132_v2 = vld [vmem:[%s4162_s4 + $0x580] sm:$0xff] }
  0xf9   : > { %2862 = vmatpush3.bf16.msra.mxu1 %v2861_v8  ;;  %v2065_v8 = vld [vmem:[%s4162_s4 + $0x398] sm:$0xff] }
  0xfa   : > { %2896 = vmatprep.subr.bf16.mxu1 %v2895_v9 }
  0xfc   : > { %1444 = vmatmul.mubr.f32.vlgmr.msra.gmra.mrb[6].mxu1 %v3349_v53 }
  0xfd   : > { %2898 = vmatpush3.bf16.msra.mxu1 %v2897_v14  ;;  %1807 = vmatprep.mubr.f32.mxu1 %v3359_v56  ;;  %v2739_v14 = vpack.c.bf16 %v2065_v8, %v2064_v7  ;;  %v2078_v7 = vld [vmem:[%s4161_s3 + $0x18] sm:$0xff]  ;;  %v2799_v8 = vpack.c.bf16 %v2133_v3, %v2132_v2  ;;  %v2186_v2 = vld [vmem:[%s4162_s4 + $0x700] sm:$0xff]  ;;  %v2187_v3 = vld [vmem:[%s4162_s4 + $0x708] sm:$0xff] }
  0xfe   : > { %2900 = vmatprep.subr.bf16.mxu1 %v2899_v15  ;;  %v2048_v15 = vld [vmem:[%s4162_s4 + $0x310] sm:$0xff] }
  0xff   : > { %v2741_v19 = vpack.c.bf16 %v2049_v16, %v2048_v15  ;;  %v2118_v16 = vld [vmem:[%s4162_s4 + $0x510] sm:$0xff] }
 0x101   : > { %2902 = vmatpush3.bf16.msra.mxu1 %v2901_v20  ;;  %v2743_v20 = vpack.c.bf16 %v2067_v18, %v2066_v17  ;;  %v2119_v17 = vld [vmem:[%s4162_s4 + $0x518] sm:$0xff]  ;;  %v2136_v18 = vld [vmem:[%s4162_s4 + $0x5a0] sm:$0xff] }
 0x102   : > { %2904 = vmatprep.subr.bf16.mxu1 %v2903_v21  ;;  %v2050_v21 = vld [vmem:[%s4162_s4 + $0x320] sm:$0xff] }
 0x103   : > { %v2745_v25 = vpack.c.bf16 %v2051_v22, %v2050_v21  ;;  %v2120_v22 = vld [vmem:[%s4162_s4 + $0x520] sm:$0xff] }
 0x105   : > { %2906 = vmatpush3.bf16.msra.mxu1 %v2905_v26  ;;  %v2747_v26 = vpack.c.bf16 %v2069_v24, %v2068_v23  ;;  %v2121_v23 = vld [vmem:[%s4162_s4 + $0x528] sm:$0xff]  ;;  %v2138_v24 = vld [vmem:[%s4162_s4 + $0x5b0] sm:$0xff] }
 0x106   : > { %2908 = vmatprep.subr.bf16.mxu1 %v2907_v27  ;;  %v2052_v27 = vld [vmem:[%s4162_s4 + $0x330] sm:$0xff] }
 0x107   : > { %v2749_v31 = vpack.c.bf16 %v2053_v28, %v2052_v27  ;;  %v2122_v28 = vld [vmem:[%s4162_s4 + $0x530] sm:$0xff] }
 0x109   : > { %2910 = vmatpush3.bf16.msra.mxu1 %v2909_v32  ;;  %v2751_v32 = vpack.c.bf16 %v2071_v30, %v2070_v29  ;;  %v2123_v29 = vld [vmem:[%s4162_s4 + $0x538] sm:$0xff]  ;;  %v2140_v30 = vld [vmem:[%s4162_s4 + $0x5c0] sm:$0xff] }
 0x10a   : > { %2912 = vmatprep.subr.bf16.mxu1 %v2911_v33  ;;  %v2054_v33 = vld [vmem:[%s4162_s4 + $0x340] sm:$0xff] }
 0x10b   : > { %v2753_v37 = vpack.c.bf16 %v2055_v34, %v2054_v33  ;;  %v2124_v34 = vld [vmem:[%s4162_s4 + $0x540] sm:$0xff] }
 0x10d   : > { %2914 = vmatpush3.bf16.msra.mxu1 %v2913_v38  ;;  %v2755_v38 = vpack.c.bf16 %v2073_v36, %v2072_v35  ;;  %v2125_v35 = vld [vmem:[%s4162_s4 + $0x548] sm:$0xff]  ;;  %v2142_v36 = vld [vmem:[%s4162_s4 + $0x5d0] sm:$0xff] }
 0x10e   : > { %2916 = vmatprep.subr.bf16.mxu1 %v2915_v39  ;;  %v2056_v39 = vld [vmem:[%s4162_s4 + $0x350] sm:$0xff] }
 0x10f   : > { %v2757_v43 = vpack.c.bf16 %v2057_v40, %v2056_v39  ;;  %v2126_v40 = vld [vmem:[%s4162_s4 + $0x550] sm:$0xff] }
 0x111   : > { %2918 = vmatpush3.bf16.msra.mxu1 %v2917_v44  ;;  %v2759_v44 = vpack.c.bf16 %v2075_v42, %v2074_v41  ;;  %v2127_v41 = vld [vmem:[%s4162_s4 + $0x558] sm:$0xff]  ;;  %v2144_v42 = vld [vmem:[%s4162_s4 + $0x5e0] sm:$0xff] }
 0x112   : > { %2920 = vmatprep.subr.bf16.mxu1 %v2919_v45  ;;  %v2058_v45 = vld [vmem:[%s4162_s4 + $0x360] sm:$0xff] }
 0x113   : > { %v2761_v49 = vpack.c.bf16 %v2059_v46, %v2058_v45  ;;  %v2128_v46 = vld [vmem:[%s4162_s4 + $0x560] sm:$0xff] }
 0x115   : > { %2922 = vmatpush3.bf16.msra.mxu1 %v2921_v50  ;;  %v2763_v50 = vpack.c.bf16 %v2077_v48, %v2076_v47  ;;  %v2129_v47 = vld [vmem:[%s4162_s4 + $0x568] sm:$0xff]  ;;  %v2146_v48 = vld [vmem:[%s4162_s4 + $0x5f0] sm:$0xff] }
 0x116   : > { %2924 = vmatprep.subr.bf16.mxu1 %v2923_v51  ;;  %v2060_v51 = vld [vmem:[%s4162_s4 + $0x370] sm:$0xff] }
 0x117   : > { %v2765_v54 = vpack.c.bf16 %v2061_v52, %v2060_v51  ;;  %v2130_v52 = vld [vmem:[%s4162_s4 + $0x570] sm:$0xff] }
 0x119   : > { %2926 = vmatpush3.bf16.msra.mxu1 %v2925_v55 }
 0x11c   : > { %1808 = vmatmul.mubr.f32.vlgmr.msra.gmra.mrb[8].mxu1 %v3349_v53 }
 0x16f   : > { %v2293_v57 = vpop.f32.mrb[0].mxu0  ;;  %v2328_v58 = vpop.f32.mrb[0].mxu1 }
 0x170   : > { %v2294_v59 = vpop.f32.mrb[1].mxu0  ;;  %v2329_v60 = vpop.f32.mrb[1].mxu1 }
 0x171   : > { %v2295_v61 = vadd.f32 %v2294_v59, %v2293_v57  ;;  %v2330_v62 = vadd.f32 %v2329_v60, %v2328_v58 }
 0x173   : > { %2595 = vmatpush3.msk.msra.mxu0 %vm468_vm1, %v2330_v62 }
 0x174   : > { %2599 = vmatprep.subr.mxu0 %v3053_v5  ;;  %2597 = vmatmul.mubr.msk.f32.vlgmr.msra.gmra.mrb[2].mxu0 %vm464_vm2, %v2006_v63 }
 0x175   : > { %2600 = vmatpush3.msk.msra.mxu0 %vm468_vm1, %v2295_v61  ;;  %2601 = vmatprep.mubr.msk.f32.mxu0 %vm3054_vm0, %v3053_v5 }
 0x176   : > { %2604 = vmatprep.subr.mxu0 %v3053_v5 }
 0x17c   : > { %2602 = vmatmul.mubr.msk.f32.vlgmr.msra.gmra.mrb[2].mxu0 %vm464_vm2, %v358_v0 }
 0x17d   : > { %2606 = vmatprep.mubr.msk.f32.mxu0 %vm3054_vm0, %v3053_v5 }
 0x18f   : > { %v2367_v6 = vpop.f32.mrb[2].mxu1 }
 0x190   : > { %v2368_v9 = vpop.f32.mrb[3].mxu1 }
 0x191   : > { %v2369_v11 = vadd.f32 %v2368_v9, %v2367_v6  ;;  %v2116_v9 = vld [vmem:[%s4162_s4 + $0x500] sm:$0xff] }
 0x193   : > { %2605 = vmatpush3.msk.msra.mxu0 %vm468_vm1, %v2369_v11  ;;  %v2134_v11 = vld [vmem:[%s4162_s4 + $0x590] sm:$0xff] }
 0x194   : > { %2607 = vmatmul.mubr.msk.f32.vlgmr.msra.gmra.mrb[2].mxu0 %vm464_vm2, %v2043_v12  ;;  %2736 = vmatprep.subr.bf16.mxu0 %v2735_v10  ;;  %v2117_v10 = vld [vmem:[%s4162_s4 + $0x508] sm:$0xff]  ;;  %v2135_v12 = vld [vmem:[%s4162_s4 + $0x598] sm:$0xff] }
 0x195   : > { %2738 = vmatpush3.bf16.msra.mxu0 %v2737_v13  ;;  %897 = vmatprep.mubr.f32.mxu0 %v3359_v56  ;;  %v2113_v13 = vld [vmem:[%s4161_s3 + $0x20] sm:$0xff]  ;;  %v2803_v15 = vpack.c.bf16 %v2135_v12, %v2134_v11  ;;  %v2207_v12 = vld [vmem:[%s4162_s4 + $0x7a8] sm:$0xff] }
 0x196   : > { %2740 = vmatprep.subr.bf16.mxu0 %v2739_v14  ;;  %v2801_v14 = vpack.c.bf16 %v2117_v10, %v2116_v9  ;;  %v2188_v9 = vld [vmem:[%s4162_s4 + $0x710] sm:$0xff]  ;;  %v2189_v10 = vld [vmem:[%s4162_s4 + $0x718] sm:$0xff]  ;;  %v2206_v11 = vld [vmem:[%s4162_s4 + $0x7a0] sm:$0xff] }
 0x199   : > { %2742 = vmatpush3.bf16.msra.mxu0 %v2741_v19  ;;  %v2137_v19 = vld [vmem:[%s4162_s4 + $0x5a8] sm:$0xff] }
 0x19a   : > { %2744 = vmatprep.subr.bf16.mxu0 %v2743_v20  ;;  %v2805_v20 = vpack.c.bf16 %v2119_v17, %v2118_v16  ;;  %v2807_v21 = vpack.c.bf16 %v2137_v19, %v2136_v18  ;;  %v2191_v16 = vld [vmem:[%s4162_s4 + $0x728] sm:$0xff]  ;;  %v2208_v17 = vld [vmem:[%s4162_s4 + $0x7b0] sm:$0xff]  ;;  %v2209_v18 = vld [vmem:[%s4162_s4 + $0x7b8] sm:$0xff] }
 0x19b   : > { %v2875_v19 = vpack.c.bf16 %v2209_v18, %v2208_v17 }
 0x19d   : > { %2746 = vmatpush3.bf16.msra.mxu0 %v2745_v25  ;;  %v2139_v25 = vld [vmem:[%s4162_s4 + $0x5b8] sm:$0xff] }
 0x19e   : > { %2748 = vmatprep.subr.bf16.mxu0 %v2747_v26  ;;  %v2809_v26 = vpack.c.bf16 %v2121_v23, %v2120_v22  ;;  %v2811_v27 = vpack.c.bf16 %v2139_v25, %v2138_v24  ;;  %v2210_v22 = vld [vmem:[%s4162_s4 + $0x7c0] sm:$0xff]  ;;  %v2211_v23 = vld [vmem:[%s4162_s4 + $0x7c8] sm:$0xff] }
 0x19f   : > { %v2879_v25 = vpack.c.bf16 %v2211_v23, %v2210_v22 }
 0x1a1   : > { %2750 = vmatpush3.bf16.msra.mxu0 %v2749_v31  ;;  %v2141_v31 = vld [vmem:[%s4162_s4 + $0x5c8] sm:$0xff] }
 0x1a2   : > { %2752 = vmatprep.subr.bf16.mxu0 %v2751_v32  ;;  %v2813_v32 = vpack.c.bf16 %v2123_v29, %v2122_v28  ;;  %v2815_v33 = vpack.c.bf16 %v2141_v31, %v2140_v30  ;;  %v2212_v28 = vld [vmem:[%s4162_s4 + $0x7d0] sm:$0xff]  ;;  %v2213_v29 = vld [vmem:[%s4162_s4 + $0x7d8] sm:$0xff] }
 0x1a3   : > { %v2883_v31 = vpack.c.bf16 %v2213_v29, %v2212_v28 }
 0x1a5   : > { %2754 = vmatpush3.bf16.msra.mxu0 %v2753_v37  ;;  %v2143_v37 = vld [vmem:[%s4162_s4 + $0x5d8] sm:$0xff] }
 0x1a6   : > { %2756 = vmatprep.subr.bf16.mxu0 %v2755_v38  ;;  %v2817_v38 = vpack.c.bf16 %v2125_v35, %v2124_v34  ;;  %v2819_v39 = vpack.c.bf16 %v2143_v37, %v2142_v36  ;;  %v2214_v34 = vld [vmem:[%s4162_s4 + $0x7e0] sm:$0xff]  ;;  %v2215_v35 = vld [vmem:[%s4162_s4 + $0x7e8] sm:$0xff] }
 0x1a7   : > { %v2887_v37 = vpack.c.bf16 %v2215_v35, %v2214_v34 }
 0x1a9   : > { %2758 = vmatpush3.bf16.msra.mxu0 %v2757_v43  ;;  %v2145_v43 = vld [vmem:[%s4162_s4 + $0x5e8] sm:$0xff] }
 0x1aa   : > { %2760 = vmatprep.subr.bf16.mxu0 %v2759_v44  ;;  %v2821_v44 = vpack.c.bf16 %v2127_v41, %v2126_v40  ;;  %v2823_v45 = vpack.c.bf16 %v2145_v43, %v2144_v42  ;;  %v2216_v40 = vld [vmem:[%s4162_s4 + $0x7f0] sm:$0xff]  ;;  %v2217_v41 = vld [vmem:[%s4162_s4 + $0x7f8] sm:$0xff] }
 0x1ab   : > { %v2891_v43 = vpack.c.bf16 %v2217_v41, %v2216_v40 }
 0x1ad   : > { %2762 = vmatpush3.bf16.msra.mxu0 %v2761_v49  ;;  %v2147_v49 = vld [vmem:[%s4162_s4 + $0x5f8] sm:$0xff] }
 0x1ae   : > { %2764 = vmatprep.subr.bf16.mxu0 %v2763_v50  ;;  %v2825_v50 = vpack.c.bf16 %v2129_v47, %v2128_v46  ;;  %v2827_v51 = vpack.c.bf16 %v2147_v49, %v2146_v48 }
 0x1af   : > { %v2441_v55 = vpop.f32.mrb[4].mxu1 }
 0x1b0   : > { %v2442_v57 = vpop.f32.mrb[5].mxu1 }
 0x1b1   : > { %v2443_v58 = vadd.f32 %v2442_v57, %v2441_v55  ;;  %2766 = vmatpush3.bf16.msra.mxu0 %v2765_v54  ;;  %v2131_v54 = vld [vmem:[%s4162_s4 + $0x578] sm:$0xff] }
 0x1b2   : > { %2609 = vmatprep.subr.mxu0 %v3053_v5  ;;  %v2829_v55 = vpack.c.bf16 %v2131_v54, %v2130_v52 }
 0x1b4   : > { %898 = vmatmul.mubr.f32.vlgmr.msra.gmra.mrb[4].mxu0 %v3349_v53 }
 0x1b5   : > { %2611 = vmatprep.mubr.msk.f32.mxu0 %vm3054_vm0, %v3053_v5 }
 0x1cf   : > { %v2515_v59 = vpop.f32.mrb[6].mxu1 }
 0x1d0   : > { %v2516_v60 = vpop.f32.mrb[7].mxu1 }
 0x1d1   : > { %v3864_v61 = vadd.f32 %v2516_v60, %v2515_v59  ;;  %v2203_v59 = vld [vmem:[%s4162_s4 + $0x788] sm:$0xff] }
 0x1ef   : > { %v2589_v62 = vpop.f32.mrb[8].mxu1 }
 0x1f0   : > { %v2590_v63 = vpop.f32.mrb[9].mxu1 }
 0x1f1   : > { %v3866_v0 = vadd.f32 %v2590_v63, %v2589_v62  ;;  %v2148_v63 = vld [vmem:[%s4161_s3 + $0x28] sm:$0xff] }
 0x287   : > { %v2404_v1 = vpop.f32.mrb[4].mxu0 }
 0x288   : > { %v2405_v4 = vpop.f32.mrb[5].mxu0 }
 0x289   : > { %v2406_v6 = vadd.f32 %v2405_v4, %v2404_v1  ;;  %v2204_v4 = vld [vmem:[%s4162_s4 + $0x790] sm:$0xff] }
 0x28b   : > { %2610 = vmatpush3.msk.msra.mxu0 %vm468_vm1, %v2406_v6  ;;  %v2183_v6 = vld [vmem:[%s4161_s3 + $0x30] sm:$0xff] }
 0x28c   : > { %2612 = vmatmul.mubr.msk.f32.vlgmr.msra.gmra.mrb[2].mxu0 %vm464_vm2, %v2078_v7  ;;  %2614 = vmatprep.subr.mxu0 %v3053_v5  ;;  %v2865_v7 = vpack.c.bf16 %v2187_v3, %v2186_v2 }
 0x28d   : > { %2615 = vmatpush3.msk.msra.mxu0 %vm468_vm1, %v2443_v58  ;;  %2616 = vmatprep.mubr.msk.f32.mxu0 %vm3054_vm0, %v3053_v5  ;;  %v2202_v58 = vld [vmem:[%s4162_s4 + $0x780] sm:$0xff] }
 0x28e   : > { %2800 = vmatprep.subr.bf16.mxu0 %v2799_v8  ;;  %v2863_v1 = vpack.c.bf16 %v2203_v59, %v2202_v58 }
 0x294   : > { %2617 = vmatmul.mubr.msk.f32.vlgmr.msra.gmra.mrb[2].mxu0 %vm464_vm2, %v2113_v13  ;;  %v2869_v13 = vpack.c.bf16 %v2189_v10, %v2188_v9 }
 0x295   : > { %2802 = vmatpush3.bf16.msra.mxu0 %v2801_v14  ;;  %1261 = vmatprep.mubr.f32.mxu0 %v3359_v56  ;;  %v2871_v14 = vpack.c.bf16 %v2207_v12, %v2206_v11 }
 0x296   : > { %2804 = vmatprep.subr.bf16.mxu0 %v2803_v15  ;;  %v2190_v15 = vld [vmem:[%s4162_s4 + $0x720] sm:$0xff] }
 0x299   : > { %2806 = vmatpush3.bf16.msra.mxu0 %v2805_v20  ;;  %v2192_v20 = vld [vmem:[%s4162_s4 + $0x730] sm:$0xff] }
 0x29a   : > { %2808 = vmatprep.subr.bf16.mxu0 %v2807_v21  ;;  %v2193_v21 = vld [vmem:[%s4162_s4 + $0x738] sm:$0xff] }
 0x29b   : > { %v2877_v24 = vpack.c.bf16 %v2193_v21, %v2192_v20 }
 0x29d   : > { %2810 = vmatpush3.bf16.msra.mxu0 %v2809_v26  ;;  %v2194_v26 = vld [vmem:[%s4162_s4 + $0x740] sm:$0xff] }
 0x29e   : > { %2812 = vmatprep.subr.bf16.mxu0 %v2811_v27  ;;  %v2195_v27 = vld [vmem:[%s4162_s4 + $0x748] sm:$0xff] }
 0x29f   : > { %v2881_v30 = vpack.c.bf16 %v2195_v27, %v2194_v26 }
 0x2a1   : > { %2814 = vmatpush3.bf16.msra.mxu0 %v2813_v32  ;;  %v2196_v32 = vld [vmem:[%s4162_s4 + $0x750] sm:$0xff] }
 0x2a2   : > { %2816 = vmatprep.subr.bf16.mxu0 %v2815_v33  ;;  %v2197_v33 = vld [vmem:[%s4162_s4 + $0x758] sm:$0xff] }
 0x2a3   : > { %v2885_v36 = vpack.c.bf16 %v2197_v33, %v2196_v32 }
 0x2a5   : > { %2818 = vmatpush3.bf16.msra.mxu0 %v2817_v38  ;;  %v2198_v38 = vld [vmem:[%s4162_s4 + $0x760] sm:$0xff] }
 0x2a6   : > { %2820 = vmatprep.subr.bf16.mxu0 %v2819_v39  ;;  %v2199_v39 = vld [vmem:[%s4162_s4 + $0x768] sm:$0xff] }
 0x2a7   : > { %v2889_v42 = vpack.c.bf16 %v2199_v39, %v2198_v38 }
 0x2a9   : > { %2822 = vmatpush3.bf16.msra.mxu0 %v2821_v44  ;;  %v2200_v44 = vld [vmem:[%s4162_s4 + $0x770] sm:$0xff] }
 0x2aa   : > { %2824 = vmatprep.subr.bf16.mxu0 %v2823_v45  ;;  %v2201_v45 = vld [vmem:[%s4162_s4 + $0x778] sm:$0xff] }
 0x2ab   : > { %v2893_v46 = vpack.c.bf16 %v2201_v45, %v2200_v44 }
 0x2ad   : > { %2826 = vmatpush3.bf16.msra.mxu0 %v2825_v50  ;;  %v2218_v50 = vld [vmem:[%s4161_s3 + $0x38] sm:$0xff] }
 0x2ae   : > { %2828 = vmatprep.subr.bf16.mxu0 %v2827_v51 }
 0x2b1   : > { %2830 = vmatpush3.bf16.msra.mxu0 %v2829_v55 }
 0x2b2   : > { %2619 = vmatprep.subr.mxu0 %v3053_v5 }
 0x2b4   : > { %1262 = vmatmul.mubr.f32.vlgmr.msra.gmra.mrb[6].mxu0 %v3349_v53 }
 0x2b5   : > { %2621 = vmatprep.mubr.msk.f32.mxu0 %vm3054_vm0, %v3053_v5 }
 0x387   : > { %v2478_v57 = vpop.f32.mrb[6].mxu0 }
 0x388   : > { %v2479_v60 = vpop.f32.mrb[7].mxu0 }
 0x389   : > { %v2480_v62 = vadd.f32 %v2479_v60, %v2478_v57 }
 0x38b   : > { %2620 = vmatpush3.msk.msra.mxu0 %vm468_vm1, %v2480_v62 }
 0x38c   : > { %2622 = vmatmul.mubr.msk.f32.vlgmr.msra.gmra.mrb[2].mxu0 %vm464_vm2, %v2148_v63  ;;  %2624 = vmatprep.subr.mxu0 %v3053_v5 }
 0x38d   : > { %2625 = vmatpush3.msk.msra.mxu0 %vm468_vm1, %v3864_v61  ;;  %2626 = vmatprep.mubr.msk.f32.mxu0 %vm3054_vm0, %v3053_v5  ;;  %v2205_v61 = vld [vmem:[%s4162_s4 + $0x798] sm:$0xff] }
 0x38e   : > { %2864 = vmatprep.subr.bf16.mxu0 %v2863_v1  ;;  %v2867_v8 = vpack.c.bf16 %v2205_v61, %v2204_v4 }
 0x394   : > { %2627 = vmatmul.mubr.msk.f32.vlgmr.msra.gmra.mrb[2].mxu0 %vm464_vm2, %v2183_v6 }
 0x395   : > { %2866 = vmatpush3.bf16.msra.mxu0 %v2865_v7  ;;  %1625 = vmatprep.mubr.f32.mxu0 %v3359_v56  ;;  %v2873_v56 = vpack.c.bf16 %v2191_v16, %v2190_v15 }
 0x396   : > { %2868 = vmatprep.subr.bf16.mxu0 %v2867_v8 }
 0x399   : > { %2870 = vmatpush3.bf16.msra.mxu0 %v2869_v13 }
 0x39a   : > { %2872 = vmatprep.subr.bf16.mxu0 %v2871_v14 }
 0x39d   : > { %2874 = vmatpush3.bf16.msra.mxu0 %v2873_v56 }
 0x39e   : > { %2876 = vmatprep.subr.bf16.mxu0 %v2875_v19 }
 0x3a1   : > { %2878 = vmatpush3.bf16.msra.mxu0 %v2877_v24 }
 0x3a2   : > { %2880 = vmatprep.subr.bf16.mxu0 %v2879_v25 }
 0x3a5   : > { %2882 = vmatpush3.bf16.msra.mxu0 %v2881_v30 }
 0x3a6   : > { %2884 = vmatprep.subr.bf16.mxu0 %v2883_v31 }
 0x3a9   : > { %2886 = vmatpush3.bf16.msra.mxu0 %v2885_v36 }
 0x3aa   : > { %2888 = vmatprep.subr.bf16.mxu0 %v2887_v37 }
 0x3ad   : > { %2890 = vmatpush3.bf16.msra.mxu0 %v2889_v42 }
 0x3ae   : > { %2892 = vmatprep.subr.bf16.mxu0 %v2891_v43 }
 0x3b1   : > { %2894 = vmatpush3.bf16.msra.mxu0 %v2893_v46 }
 0x3b2   : > { %2629 = vmatprep.subr.mxu0 %v3053_v5 }
 0x3b4   : > { %1626 = vmatmul.mubr.f32.vlgmr.msra.gmra.mrb[8].mxu0 %v3349_v53  ;;  %v2253_v53 = vld [vmem:[%s4161_s3 + $0x40] sm:$0xff] }
 0x3b5   : > { %2631 = vmatprep.mubr.msk.f32.mxu0 %vm3054_vm0, %v3053_v5 }
 0x487   : > { %v2552_v47 = vpop.f32.mrb[8].mxu0 }
 0x488   : > { %v2553_v48 = vpop.f32.mrb[9].mxu0 }
 0x489   : > { %v2554_v49 = vadd.f32 %v2553_v48, %v2552_v47 }
 0x48b   : > { %2630 = vmatpush3.msk.msra.mxu0 %vm468_vm1, %v2554_v49 }
 0x48c   : > { %2632 = vmatmul.mubr.msk.f32.vlgmr.msra.gmra.mrb[2].mxu0 %vm464_vm2, %v2218_v50  ;;  %2634 = vmatprep.subr.mxu0 %v3053_v5 }
 0x48d   : > { %2635 = vmatpush3.msk.msra.mxu0 %vm468_vm1, %v3866_v0  ;;  %2636 = vmatprep.mubr.msk.f32.mxu0 %vm3054_vm0, %v3053_v5 }
 0x494   : > { %2637 = vmatmul.mubr.msk.f32.vlgmr.msra.gmra.mrb[2].mxu0 %vm464_vm2, %v2253_v53 }
 0x567   : > { %v1887_v5 = vpop.f32.mrb[2].mxu0 }
 0x568   : > { %1893 = vst.msk [vmem:[%s217_s25] sm:$0xff] %vm1892_vm3, %v1887_v5  ;;  %v2638_v0 = vpop.f32.mrb[3].mxu0 }
 0x569   : > { %3000 = shalt.err (!%p2997_p3)
}
 0x56a   : > { %s3001_s12 = scalar_lea.hbm %s4116_s7, 128  ;;  %s3005_s15 = scalar_lea.hbm %s4163_s5, 256 }
 0x56b   : > { %p3002_p4 = scmp.ne.s32.totalorder %s4116_s7, %s3001_s12  ;;  %p3006_p9 = scmp.lt.u32.totalorder %s4116_s7, %s4163_s5 }
 0x56c   : > { %p3007_p10 = scmp.lt.u32.totalorder %s3005_s15, %s3001_s12  ;;  %p3009_p12 = scmp.lt.u32.totalorder %s3001_s12, %s4116_s7 }
 0x56d   : > { %p3003_p7 = pnand %p3002_p4, %p3124_p5 }
 0x56e   : > { %p3008_p11 = por %p3007_p10, %p3006_p9 }
 0x56f   : > { %p3004_p8 = pneg %p3003_p7 }
 0x570   : > { %p3010_p13 = por %p3009_p12, %p3008_p11 }
 0x572   : > { %p3011_p0 = pnand %p3010_p13, %p3004_p8 }
 0x574   : > { %3014 = shalt.err (!%p3011_p0)
}
 0x575   : > { %2943 = dma.vmem_to_hbm [thread:$0]  (%p3124_p5), %s4118_s26, 128, %s4116_s7, %s1895_s8  }
 0x576 PF: > { %p2949_p1 = scmp.ge.s32.totalorder %s3049_s21, 2  ;;  %s1920_s23 = sand.u32 1, %s3037_s18  }
 0x577   : > { %s1921_s25 = scalar_lea.sflag [#allocation3], %s1920_s23 }
 0x578   : > { %p2946_p2 = pnand %p2949_p1, %p3128_p6 }
 0x57a   : > { %3032 = dma.done.wait (!%p2946_p2), %s1921_s25, 128  }
 0x57b   : > { %3034 = vsyncadd (!%p2946_p2), %s1921_s25, 4294967168  ;;  %p15_p3 = scmp.ge.s32.totalorder %s3111_s24, 4   ;;  %s4166_s18 = smov %s3041_s19 }
 0x57c   : > { %s4167_s19 = smov %s3045_s20  ;;  %s4168_s20 = smov %s3122_s27 }
 0x57d   : > { %s4169_s21 = smov %s3111_s24  ;;  %17 = sbr.rel (!%p15_p3) target bundleno = 3 (0x3), region = 91 }
 0x584   :  { %1926 = vsyncpa [#allocation3], 1 }
 0x585   :  { %1928 = vsyncpa [#allocation3 + $0x1], 1 }

</bundles_post_ra>
